<compile_context>
chip_gen: v7x
topology: tpu7x:2x2x1
jax: 0.10.0
libtpu: 0.0.40
codegen_flags: <defaults>
</compile_context>

<pallas_src>
import functools

import jax
import jax.numpy as jnp
from jax import lax
from jax.experimental import pallas as pl
from jax.experimental.pallas import tpu as pltpu


MXU_ALIGN = 256  # v6e/v7x MXU is 2x256x256; 128-wide panels run at half width.


# ---------------------------------------------------------------------------
# helpers
# ---------------------------------------------------------------------------
def _round_up(v, m):
    return ((v + m - 1) // m) * m


def _pad2(a, rows, cols):
    a = a.astype(jnp.float32)
    out = jnp.zeros((rows, cols), jnp.float32)
    return out.at[: a.shape[0], : a.shape[1]].set(a)


def _pad_row(v, cols):
    v = v.astype(jnp.float32)
    out = jnp.zeros((1, cols), jnp.float32)
    return out.at[0, : v.shape[0]].set(v)


def bn_fold(gamma, beta, mean, var, eps=1e-5):
    s = gamma / jnp.sqrt(var + eps)
    t = beta - mean * s
    return s, t


def _pick_vmem_limit(footprint_bytes):
    """Footprint-derived VMEM limit, clamped to the chip's physical capacity."""
    try:
        cap = int(getattr(pltpu.get_tpu_info(), "vmem_capacity_bytes",
                          64 * 1024 * 1024))
    except Exception:
        cap = 64 * 1024 * 1024          # conservative (v7x per-TC VMEM)
    want = int(footprint_bytes * 1.3) + (8 << 20)
    return int(max(32 << 20, min(want, int(cap * 0.9))))


# ---------------------------------------------------------------------------
# fused kernel: patch-embed (K-streamed, f32 accum) -> LocalEmbedding + norm
# ---------------------------------------------------------------------------
def _local_kernel(x_ref, wp_ref, bp_ref, lw1_ref, lb1_ref, lw2_ref, lb2_ref,
                  vatt_ref, acc_ref):
    k = pl.program_id(1)

    @pl.when(k == 0)
    def _():
        acc_ref[...] = jnp.zeros_like(acc_ref)

    # Stand-in frozen visual extractor hot path: patch-embedding matmul,
    # streamed over the contraction dim K with an f32 VMEM accumulator.
    acc_ref[...] += jnp.dot(x_ref[...], wp_ref[...],
                            preferred_element_type=jnp.float32)

    @pl.when(k == pl.num_programs(1) - 1)
    def _():
        att = acc_ref[...] + bp_ref[...]
        # LocalEmbedding: Conv1d(k=1) -> BN -> ReLU -> Conv1d(k=1) -> BN(no
        # affine), with BN folded into the weights, then F.normalize(dim=-1).
        h = jnp.dot(att.astype(jnp.bfloat16), lw1_ref[...],
                    preferred_element_type=jnp.float32) + lb1_ref[...]
        h = jnp.maximum(h, 0.0)
        y = jnp.dot(h.astype(jnp.bfloat16), lw2_ref[...],
                    preferred_element_type=jnp.float32) + lb2_ref[...]
        inv = lax.rsqrt(
            jnp.maximum(jnp.sum(y * y, axis=-1, keepdims=True), 1e-24))
        vatt_ref[...] = (y * inv).astype(vatt_ref.dtype)


# ---------------------------------------------------------------------------
# trace-time prep: patchify, fold BN into weights, pad to MXU-aligned dims
# ---------------------------------------------------------------------------
def _prepare(images, params, patch):
    B, C, H, W = images.shape
    P = patch
    N = (H // P) * (W // P)
    K = C * P * P
    Dv = params["w_patch"].shape[1]
    Dout = params["l_w2"].shape[1]

    Kp = _round_up(K, MXU_ALIGN)
    Dvp = _round_up(Dv, MXU_ALIGN)
    Doutp = _round_up(Dout, MXU_ALIGN)

    # TODO(synk): the real ResNet101 / ViT-B-32 backbone is not reproduced; a
    # frozen patch-embedding matmul stands in, exposing the same interface
    # (att_feats (B,N,Dv), fc_feats = token mean).
    x = images.reshape(B, C, H // P, P, W // P, P)
    x = x.transpose(0, 2, 4, 1, 3, 5).reshape(B, N, K)
    x = jnp.pad(x, ((0, 0), (0, 0), (0, Kp - K)))
    x_tok = x.astype(jnp.bfloat16)                       # (B, N, Kp)

    # TODO(synk): BatchNorm folded with eval-mode running statistics (the
    # natural setting for an "Inference" module); train-mode batch stats are
    # not reproduced.
    s1l, t1l = bn_fold(params["l_bn1_g"], params["l_bn1_b"],
                       params["l_bn1_m"], params["l_bn1_v"])
    s2l, t2l = bn_fold(jnp.ones_like(params["l_bn2_m"]),
                       jnp.zeros_like(params["l_bn2_m"]),
                       params["l_bn2_m"], params["l_bn2_v"])     # affine=False
    s1g, t1g = bn_fold(params["g_bn1_g"], params["g_bn1_b"],
                       params["g_bn1_m"], params["g_bn1_v"])
    s2g, t2g = bn_fold(jnp.ones_like(params["g_bn2_m"]),
                       jnp.zeros_like(params["g_bn2_m"]),
                       params["g_bn2_m"], params["g_bn2_v"])     # affine=False

    lw1 = params["l_w1"] * s1l[None, :]
    lb1 = params["l_b1"] * s1l + t1l
    lw2 = params["l_w2"] * s2l[None, :]
    lb2 = params["l_b2"] * s2l + t2l
    gw1 = params["g_w1"] * s1g[None, :]
    gb1 = params["g_b1"] * s1g + t1g
    gw2 = params["g_w2"] * s2g[None, :]
    gb2 = t2g                                            # Linear(bias=False)

    w = dict(
        wp=_pad2(params["w_patch"], Kp, Dvp).astype(jnp.bfloat16),
        bp=_pad_row(params["b_patch"], Dvp),
        lw1=_pad2(lw1, Dvp, Dvp).astype(jnp.bfloat16),
        lb1=_pad_row(lb1, Dvp),
        lw2=_pad2(lw2, Dvp, Doutp).astype(jnp.bfloat16),
        lb2=_pad_row(lb2, Doutp),
        gw1=_pad2(gw1, Dvp, Dvp).astype(jnp.bfloat16),
        gb1=_pad_row(gb1, Dvp),
        gw2=_pad2(gw2, Dvp, Doutp).astype(jnp.bfloat16),
        gb2=_pad_row(gb2, Doutp),
    )
    dims = dict(B=B, N=N, Kp=Kp, Dvp=Dvp, Dout=Dout, Doutp=Doutp)
    return x_tok, w, dims


# ---------------------------------------------------------------------------
# GlobalEmbedding head, hoisted out of the kernel (tiny (B, Dv) work).
# ---------------------------------------------------------------------------
def _global_head(x_tok, w):
    # fc_feats = mean over tokens of att = mean(x) @ Wp + bp, exact for the
    # linear patch-embed stand-in.
    # TODO(synk): a nonlinear backbone would need the pool over att itself
    # (in-kernel accumulation or segment-sum); hoisted here per perf review.
    x_mean = jnp.mean(x_tok.astype(jnp.float32), axis=1)             # (B, Kp)
    fc = jnp.dot(x_mean.astype(jnp.bfloat16), w["wp"],
                 preferred_element_type=jnp.float32) + w["bp"]
    gh = jnp.dot(fc.astype(jnp.bfloat16), w["gw1"],
                 preferred_element_type=jnp.float32) + w["gb1"]
    gh = jnp.maximum(gh, 0.0)
    gy = jnp.dot(gh.astype(jnp.bfloat16), w["gw2"],
                 preferred_element_type=jnp.float32) + w["gb2"]
    inv = lax.rsqrt(jnp.maximum(jnp.sum(gy * gy, -1, keepdims=True), 1e-24))
    return gy * inv                                                  # (B, Doutp)


# ---------------------------------------------------------------------------
# pallas_call builder for the fused local path
# ---------------------------------------------------------------------------
def _local_embedding_pallas(x_flat, w, dims, *, tm, tk,
                            single_buffer_weights=True):
    Mp, Kp = x_flat.shape
    Dvp, Doutp = dims["Dvp"], dims["Doutp"]
    num_k = Kp // tk

    def wspec(shape, imap, stream=False):
        # Constant-index (logically resident) weights: single-buffer to halve
        # their VMEM footprint.  The K-streamed wp keeps default 2-deep
        # buffering unless there is only one K step.
        if single_buffer_weights and (not stream or num_k == 1):
            return pl.BlockSpec(shape, imap, pipeline_mode=pl.Buffered(1))
        return pl.BlockSpec(shape, imap)

    in_specs = [
        pl.BlockSpec((tm, tk), lambda i, k: (i, k)),               # x tokens
        wspec((tk, Dvp), lambda i, k: (k, 0), stream=True),        # w_patch
        wspec((1, Dvp), lambda i, k: (0, 0)),                      # b_patch
        wspec((Dvp, Dvp), lambda i, k: (0, 0)),                    # local w1
        wspec((1, Dvp), lambda i, k: (0, 0)),                      # local b1
        wspec((Dvp, Doutp), lambda i, k: (0, 0)),                  # local w2
        wspec((1, Doutp), lambda i, k: (0, 0)),                    # local b2
    ]
    out_specs = pl.BlockSpec((tm, Doutp), lambda i, k: (i, 0))
    out_shape = jax.ShapeDtypeStruct((Mp, Doutp), jnp.float32)

    # VMEM footprint (bytes) -> vmem_limit
    wbuf = 1 if single_buffer_weights else 2
    wpbuf = 1 if (single_buffer_weights and num_k == 1) else 2
    footprint = (2 * tm * tk * 2                                    # x (bf16)
                 + wpbuf * tk * Dvp * 2                             # wp (bf16)
                 + wbuf * (Dvp * Dvp + Dvp * Doutp) * 2             # lw1, lw2
                 + wbuf * (2 * Dvp + Doutp) * 4                     # biases
                 + 2 * tm * Doutp * 4                               # out (f32)
                 + tm * Dvp * 4)                                    # acc scratch
    vmem_limit = _pick_vmem_limit(footprint)

    flops = 2 * Mp * (Kp * Dvp + Dvp * Dvp + Dvp * Doutp)
    bytes_accessed = int(x_flat.size * 2
                         + (Kp * Dvp + Dvp * Dvp + Dvp * Doutp) * 2
                         + (2 * Dvp + Doutp) * 4
                         + Mp * Doutp * 4)

    return pl.pallas_call(
        _local_kernel,
        grid_spec=pltpu.PrefetchScalarGridSpec(
            num_scalar_prefetch=0,
            grid=(Mp // tm, num_k),                 # M tiles parallel, K inner
            in_specs=in_specs,
            out_specs=out_specs,
            scratch_shapes=[pltpu.VMEM((tm, Dvp), jnp.float32)],   # att accum
        ),
        out_shape=out_shape,
        compiler_params=pltpu.CompilerParams(
            dimension_semantics=("parallel", "arbitrary"),
            vmem_limit_bytes=vmem_limit),
        cost_estimate=pl.CostEstimate(
            flops=int(flops),
            transcendentals=int(Mp),
            bytes_accessed=bytes_accessed),
    )(x_flat, w["wp"], w["bp"], w["lw1"], w["lb1"], w["lw2"], w["lb2"])


# ---------------------------------------------------------------------------
# forward
# ---------------------------------------------------------------------------
def pretrain_inference_forward(images, params, patch, *, tm=256,
                               single_buffer_weights=True):
    """images: (B, C, H, W) NCHW f32. Returns v_feats: (B, 1 + N, output_dim)."""
    x_tok, w, d = _prepare(images, params, patch)
    B, N, Dout, Doutp = d["B"], d["N"], d["Dout"], d["Doutp"]
    Kp = x_tok.shape[-1]

    # Flatten (B, N) -> M so the MXU M-dim stays full even for small N; pad M
    # up to the tile size (pad rows sliced off below).
    Mtot = B * N
    tm = min(tm, _round_up(Mtot, 8))
    Mp = _round_up(Mtot, tm)
    x_flat = x_tok.reshape(Mtot, Kp)
    if Mp != Mtot:
        x_flat = jnp.pad(x_flat, ((0, Mp - Mtot), (0, 0)))

    # K tile for streaming the patch-embed weight.
    tk = next(c for c in (512, 384, 256, 128) if Kp % c == 0)

    v_att_p = _local_embedding_pallas(
        x_flat, w, d, tm=tm, tk=tk,
        single_buffer_weights=single_buffer_weights)

    v_att = v_att_p[:Mtot].reshape(B, N, Doutp)[:, :, :Dout]
    v_fc = _global_head(x_tok, w)[:, None, :Dout]
    return jnp.concatenate([v_fc, v_att], axis=1)


# ---------------------------------------------------------------------------
# pure-JAX reference mirroring the kernel math (same bf16 casts / folded BN)
# ---------------------------------------------------------------------------
def reference_forward(images, params, patch):
    x_tok, w, d = _prepare(images, params, patch)
    Dout = d["Dout"]

    att = jnp.einsum("bnk,kd->bnd", x_tok, w["wp"],
                     preferred_element_type=jnp.float32) + w["bp"][None]
    h = jnp.einsum("bnd,de->bne", att.astype(jnp.bfloat16), w["lw1"],
                   preferred_element_type=jnp.float32) + w["lb1"][None]
    h = jnp.maximum(h, 0.0)
    y = jnp.einsum("bnd,de->bne", h.astype(jnp.bfloat16), w["lw2"],
                   preferred_element_type=jnp.float32) + w["lb2"][None]
    v_att = y * lax.rsqrt(jnp.maximum(jnp.sum(y * y, -1, keepdims=True), 1e-24))

    v_fc = _global_head(x_tok, w)[:, None, :]
    return jnp.concatenate([v_fc[:, :, :Dout], v_att[:, :, :Dout]], axis=1)


if __name__ == "__main__":
    key = jax.random.PRNGKey(0)
    B, C, H, W = 2, 4, 16, 16      # images (NCHW, like PyTorch)
    P = 4                          # stand-in patch size -> N = 16 tokens/image
    Dv = 32                        # visual_dim stand-in (2048 for real ResNet101)
    Dout = 16                      # args['output_dim']
    K = C * P * P

    ks = jax.random.split(key, 20)
    images = jax.random.normal(ks[0], (B, C, H, W), jnp.float32)

    params = {
        # frozen extractor stand-in
        "w_patch": jax.random.normal(ks[1], (K, Dv), jnp.float32) * 0.05,
        "b_patch": jax.random.normal(ks[2], (Dv,), jnp.float32) * 0.05,
        # LocalEmbedding: Conv1d(Dv,Dv,1)+BN(Dv)+ReLU+Conv1d(Dv,Dout,1)+BN(Dout,affine=False)
        "l_w1": jax.random.normal(ks[3], (Dv, Dv), jnp.float32) * 0.1,
        "l_b1": jax.random.normal(ks[4], (Dv,), jnp.float32) * 0.1,
        "l_bn1_g": 1.0 + 0.1 * jax.random.normal(ks[5], (Dv,), jnp.float32),
        "l_bn1_b": 0.1 * jax.random.normal(ks[6], (Dv,), jnp.float32),
        "l_bn1_m": 0.1 * jax.random.normal(ks[7], (Dv,), jnp.float32),
        "l_bn1_v": 0.5 + jax.random.uniform(ks[8], (Dv,), jnp.float32),
        "l_w2": jax.random.normal(ks[9], (Dv, Dout), jnp.float32) * 0.1,
        "l_b2": jax.random.normal(ks[10], (Dout,), jnp.float32) * 0.1,
        "l_bn2_m": 0.1 * jax.random.normal(ks[11], (Dout,), jnp.float32),
        "l_bn2_v": 0.5 + jax.random.uniform(ks[12], (Dout,), jnp.float32),
        # GlobalEmbedding: Linear(Dv,Dv)+BN(Dv)+ReLU+Linear(Dv,Dout,bias=False)+BN(Dout,affine=False)
        "g_w1": jax.random.normal(ks[13], (Dv, Dv), jnp.float32) * 0.1,
        "g_b1": jax.random.normal(ks[14], (Dv,), jnp.float32) * 0.1,
        "g_bn1_g": 1.0 + 0.1 * jax.random.normal(ks[15], (Dv,), jnp.float32),
        "g_bn1_b": 0.1 * jax.random.normal(ks[16], (Dv,), jnp.float32),
        "g_bn1_m": 0.1 * jax.random.normal(ks[17], (Dv,), jnp.float32),
        "g_bn1_v": 0.5 + jax.random.uniform(ks[18], (Dv,), jnp.float32),
        "g_w2": jax.random.normal(ks[19], (Dv, Dout), jnp.float32) * 0.1,
        "g_bn2_m": jnp.linspace(-0.1, 0.1, Dout, dtype=jnp.float32),
        "g_bn2_v": jnp.linspace(0.8, 1.2, Dout, dtype=jnp.float32),
    }

    def run(single_buffer):
        fwd = jax.jit(functools.partial(
            pretrain_inference_forward, patch=P,
            single_buffer_weights=single_buffer))
        return jax.block_until_ready(fwd(images, params))

    try:
        v_feats = run(True)
    except Exception:
        # TODO(synk): pl.Buffered(1) single-buffering rejected by this jax
        # build; fall back to default double-buffered weight BlockSpecs.
        v_feats = run(False)

    N = (H // P) * (W // P)
    assert v_feats.shape == (B, 1 + N, Dout), v_feats.shape
    assert bool(jnp.all(jnp.isfinite(v_feats)))
    # rows are L2-normalized
    norms = jnp.linalg.norm(v_feats, axis=-1)
    assert bool(jnp.allclose(norms, 1.0, atol=1e-3)), norms
    # matches the pure-JAX mirror of the same (bf16-MXU, BN-folded) math
    ref = jax.block_until_ready(reference_forward(images, params, P))
    assert bool(jnp.allclose(v_feats, ref, atol=2e-3, rtol=2e-3)), \
        float(jnp.max(jnp.abs(v_feats - ref)))
    print("KERNEL_OK")
</pallas_src>

<mosaic_0001>
module attributes {stable_mosaic.version = 11 : i64} {
  func.func @_local_kernel(%arg0: i32, %arg1: i32, %arg2: memref<32x256xbf16, #tpu.memory_space<vmem>>, %arg3: memref<256x256xbf16, #tpu.memory_space<vmem>>, %arg4: memref<1x256xf32, #tpu.memory_space<vmem>>, %arg5: memref<256x256xbf16, #tpu.memory_space<vmem>>, %arg6: memref<1x256xf32, #tpu.memory_space<vmem>>, %arg7: memref<256x256xbf16, #tpu.memory_space<vmem>>, %arg8: memref<1x256xf32, #tpu.memory_space<vmem>>, %arg9: memref<32x256xf32, #tpu.memory_space<vmem>>, %arg10: memref<32x256xf32, #tpu.memory_space<vmem>>) attributes {dimension_semantics = [#tpu.dimension_semantics<parallel>, #tpu.dimension_semantics<arbitrary>], iteration_bounds = array<i64: 1, 1>, scalar_prefetch = 0 : i64, scratch_operands = 1 : i64, tpu.core_type = #tpu.core_type<tc>, window_params = [{transform_indices = @transform_0, window_bounds = array<i64: 32, 256>}, {pipeline_mode = #tpu.pipeline_mode<synchronous>, transform_indices = @transform_1, window_bounds = array<i64: 256, 256>}, {pipeline_mode = #tpu.pipeline_mode<synchronous>, transform_indices = @transform_2, window_bounds = array<i64: 1, 256>}, {pipeline_mode = #tpu.pipeline_mode<synchronous>, transform_indices = @transform_3, window_bounds = array<i64: 256, 256>}, {pipeline_mode = #tpu.pipeline_mode<synchronous>, transform_indices = @transform_4, window_bounds = array<i64: 1, 256>}, {pipeline_mode = #tpu.pipeline_mode<synchronous>, transform_indices = @transform_5, window_bounds = array<i64: 256, 256>}, {pipeline_mode = #tpu.pipeline_mode<synchronous>, transform_indices = @transform_6, window_bounds = array<i64: 1, 256>}, {transform_indices = @transform_7, window_bounds = array<i64: 32, 256>}]} {
    %c0_i32 = arith.constant 0 : i32
    %0 = arith.cmpi eq, %arg1, %c0_i32 : i32
    %1 = arith.extui %0 : i1 to i32
    %c0_i32_0 = arith.constant 0 : i32
    %2 = arith.cmpi ne, %1, %c0_i32_0 : i32
    scf.if %2 {
      %cst_10 = arith.constant 0.000000e+00 : f32
      %12 = vector.broadcast %cst_10 : f32 to vector<32x256xf32>
      %c0_11 = arith.constant 0 : index
      %c0_12 = arith.constant 0 : index
      %13 = vector.load %arg10[%c0_11, %c0_12] : memref<32x256xf32, #tpu.memory_space<vmem>>, vector<32x256xf32>
      tpu.vector_store %arg10[%c0_11, %c0_12], %12 {strides = array<i32>} : memref<32x256xf32, #tpu.memory_space<vmem>>, vector<32x256xf32>,
    } else {
    }
    %c0 = arith.constant 0 : index
    %c0_1 = arith.constant 0 : index
    %3 = vector.load %arg10[%c0, %c0_1] : memref<32x256xf32, #tpu.memory_space<vmem>>, vector<32x256xf32>
    %c0_2 = arith.constant 0 : index
    %c0_3 = arith.constant 0 : index
    %4 = vector.load %arg2[%c0_2, %c0_3] : memref<32x256xbf16, #tpu.memory_space<vmem>>, vector<32x256xbf16>
    %c0_4 = arith.constant 0 : index
    %c0_5 = arith.constant 0 : index
    %5 = vector.load %arg3[%c0_4, %c0_5] : memref<256x256xbf16, #tpu.memory_space<vmem>>, vector<256x256xbf16>
    %cst = arith.constant dense<0.000000e+00> : vector<32x256xf32>
    %6 = tpu.matmul %4, %5, %cst {dimension_numbers = #tpu.dot_dimension_numbers<[1], [0], [0], [1], [0, 0, 1, 1], [], []>} : vector<32x256xbf16>, vector<256x256xbf16>, vector<32x256xf32> -> vector<32x256xf32>
    %7 = arith.addf %3, %6 : vector<32x256xf32>
    %c0_6 = arith.constant 0 : index
    %c0_7 = arith.constant 0 : index
    %8 = vector.load %arg10[%c0_6, %c0_7] : memref<32x256xf32, #tpu.memory_space<vmem>>, vector<32x256xf32>
    tpu.vector_store %arg10[%c0_6, %c0_7], %7 {strides = array<i32>} : memref<32x256xf32, #tpu.memory_space<vmem>>, vector<32x256xf32>,
    %c0_i32_8 = arith.constant 0 : i32
    %9 = arith.cmpi eq, %arg1, %c0_i32_8 : i32
    %10 = arith.extui %9 : i1 to i32
    %c0_i32_9 = arith.constant 0 : i32
    %11 = arith.cmpi ne, %10, %c0_i32_9 : i32
    scf.if %11 {
      %c0_10 = arith.constant 0 : index
      %c0_11 = arith.constant 0 : index
      %12 = vector.load %arg10[%c0_10, %c0_11] : memref<32x256xf32, #tpu.memory_space<vmem>>, vector<32x256xf32>
      %c0_12 = arith.constant 0 : index
      %c0_13 = arith.constant 0 : index
      %13 = vector.load %arg4[%c0_12, %c0_13] : memref<1x256xf32, #tpu.memory_space<vmem>>, vector<1x256xf32>
      %14 = vector.broadcast %13 : vector<1x256xf32> to vector<32x256xf32>
      %15 = arith.addf %12, %14 : vector<32x256xf32>
      %16 = arith.truncf %15 : vector<32x256xf32> to vector<32x256xbf16>
      %c0_14 = arith.constant 0 : index
      %c0_15 = arith.constant 0 : index
      %17 = vector.load %arg5[%c0_14, %c0_15] : memref<256x256xbf16, #tpu.memory_space<vmem>>, vector<256x256xbf16>
      %cst_16 = arith.constant dense<0.000000e+00> : vector<32x256xf32>
      %18 = tpu.matmul %16, %17, %cst_16 {dimension_numbers = #tpu.dot_dimension_numbers<[1], [0], [0], [1], [0, 0, 1, 1], [], []>} : vector<32x256xbf16>, vector<256x256xbf16>, vector<32x256xf32> -> vector<32x256xf32>
      %c0_17 = arith.constant 0 : index
      %c0_18 = arith.constant 0 : index
      %19 = vector.load %arg6[%c0_17, %c0_18] : memref<1x256xf32, #tpu.memory_space<vmem>>, vector<1x256xf32>
      %20 = vector.broadcast %19 : vector<1x256xf32> to vector<32x256xf32>
      %21 = arith.addf %18, %20 : vector<32x256xf32>
      %cst_19 = arith.constant 0.000000e+00 : f32
      %22 = vector.broadcast %cst_19 : f32 to vector<32x256xf32>
      %23 = arith.maximumf %21, %22 : vector<32x256xf32>
      %24 = arith.truncf %23 : vector<32x256xf32> to vector<32x256xbf16>
      %c0_20 = arith.constant 0 : index
      %c0_21 = arith.constant 0 : index
      %25 = vector.load %arg7[%c0_20, %c0_21] : memref<256x256xbf16, #tpu.memory_space<vmem>>, vector<256x256xbf16>
      %cst_22 = arith.constant dense<0.000000e+00> : vector<32x256xf32>
      %26 = tpu.matmul %24, %25, %cst_22 {dimension_numbers = #tpu.dot_dimension_numbers<[1], [0], [0], [1], [0, 0, 1, 1], [], []>} : vector<32x256xbf16>, vector<256x256xbf16>, vector<32x256xf32> -> vector<32x256xf32>
      %c0_23 = arith.constant 0 : index
      %c0_24 = arith.constant 0 : index
      %27 = vector.load %arg8[%c0_23, %c0_24] : memref<1x256xf32, #tpu.memory_space<vmem>>, vector<1x256xf32>
      %28 = vector.broadcast %27 : vector<1x256xf32> to vector<32x256xf32>
      %29 = arith.addf %26, %28 : vector<32x256xf32>
      %30 = arith.mulf %29, %29 : vector<32x256xf32>
      %cst_25 = arith.constant dense<0.000000e+00> : vector<32xf32>
      %31 = vector.multi_reduction <add>, %30, %cst_25 [1] : vector<32x256xf32> to vector<32xf32>
      %32 = vector.shape_cast %31 : vector<32xf32> to vector<32x1xf32>
      %cst_26 = arith.constant 1.000000e-24 : f32
      %33 = vector.broadcast %cst_26 : f32 to vector<32x1xf32>
      %34 = arith.maximumf %32, %33 : vector<32x1xf32>
      %35 = math.rsqrt %34 : vector<32x1xf32>
      %36 = vector.broadcast %35 : vector<32x1xf32> to vector<32x256xf32>
      %37 = arith.mulf %29, %36 : vector<32x256xf32>
      %c0_27 = arith.constant 0 : index
      %c0_28 = arith.constant 0 : index
      %38 = vector.load %arg9[%c0_27, %c0_28] : memref<32x256xf32, #tpu.memory_space<vmem>>, vector<32x256xf32>
      tpu.vector_store %arg9[%c0_27, %c0_28], %37 {strides = array<i32>} : memref<32x256xf32, #tpu.memory_space<vmem>>, vector<32x256xf32>,
    } else {
    }
    return
  }
  func.func @transform_0(%arg0: i32, %arg1: i32) -> (i32, i32) {
    %c0_i32 = arith.constant 0 : i32
    return %arg0, %arg1 : i32, i32
  }
  func.func @transform_1(%arg0: i32, %arg1: i32) -> (i32, i32) {
    %c0_i32 = arith.constant 0 : i32
    %c0_i32_0 = arith.constant 0 : i32
    return %arg1, %c0_i32 : i32, i32
  }
  func.func @transform_2(%arg0: i32, %arg1: i32) -> (i32, i32) {
    %c0_i32 = arith.constant 0 : i32
    %c0_i32_0 = arith.constant 0 : i32
    %c0_i32_1 = arith.constant 0 : i32
    return %c0_i32, %c0_i32_0 : i32, i32
  }
  func.func @transform_3(%arg0: i32, %arg1: i32) -> (i32, i32) {
    %c0_i32 = arith.constant 0 : i32
    %c0_i32_0 = arith.constant 0 : i32
    %c0_i32_1 = arith.constant 0 : i32
    return %c0_i32, %c0_i32_0 : i32, i32
  }
  func.func @transform_4(%arg0: i32, %arg1: i32) -> (i32, i32) {
    %c0_i32 = arith.constant 0 : i32
    %c0_i32_0 = arith.constant 0 : i32
    %c0_i32_1 = arith.constant 0 : i32
    return %c0_i32, %c0_i32_0 : i32, i32
  }
  func.func @transform_5(%arg0: i32, %arg1: i32) -> (i32, i32) {
    %c0_i32 = arith.constant 0 : i32
    %c0_i32_0 = arith.constant 0 : i32
    %c0_i32_1 = arith.constant 0 : i32
    return %c0_i32, %c0_i32_0 : i32, i32
  }
  func.func @transform_6(%arg0: i32, %arg1: i32) -> (i32, i32) {
    %c0_i32 = arith.constant 0 : i32
    %c0_i32_0 = arith.constant 0 : i32
    %c0_i32_1 = arith.constant 0 : i32
    return %c0_i32, %c0_i32_0 : i32, i32
  }
  func.func @transform_7(%arg0: i32, %arg1: i32) -> (i32, i32) {
    %c0_i32 = arith.constant 0 : i32
    %c0_i32_0 = arith.constant 0 : i32
    return %arg0, %c0_i32 : i32, i32
  }
}

module attributes {stable_mosaic.version = 11 : i64} {
  func.func @_local_kernel(%arg0: i32, %arg1: i32, %arg2: memref<32x256xbf16, #tpu.memory_space<vmem>>, %arg3: memref<256x256xbf16, #tpu.memory_space<vmem>>, %arg4: memref<1x256xf32, #tpu.memory_space<vmem>>, %arg5: memref<256x256xbf16, #tpu.memory_space<vmem>>, %arg6: memref<1x256xf32, #tpu.memory_space<vmem>>, %arg7: memref<256x256xbf16, #tpu.memory_space<vmem>>, %arg8: memref<1x256xf32, #tpu.memory_space<vmem>>, %arg9: memref<32x256xf32, #tpu.memory_space<vmem>>, %arg10: memref<32x256xf32, #tpu.memory_space<vmem>>) attributes {dimension_semantics = [#tpu.dimension_semantics<parallel>, #tpu.dimension_semantics<arbitrary>], iteration_bounds = array<i64: 1, 1>, scalar_prefetch = 0 : i64, scratch_operands = 1 : i64, tpu.core_type = #tpu.core_type<tc>, window_params = [{transform_indices = @transform_0, window_bounds = array<i64: 32, 256>}, {transform_indices = @transform_1, window_bounds = array<i64: 256, 256>}, {pipeline_mode = #tpu.pipeline_mode<synchronous>, transform_indices = @transform_2, window_bounds = array<i64: 1, 256>}, {pipeline_mode = #tpu.pipeline_mode<synchronous>, transform_indices = @transform_3, window_bounds = array<i64: 256, 256>}, {pipeline_mode = #tpu.pipeline_mode<synchronous>, transform_indices = @transform_4, window_bounds = array<i64: 1, 256>}, {pipeline_mode = #tpu.pipeline_mode<synchronous>, transform_indices = @transform_5, window_bounds = array<i64: 256, 256>}, {pipeline_mode = #tpu.pipeline_mode<synchronous>, transform_indices = @transform_6, window_bounds = array<i64: 1, 256>}, {transform_indices = @transform_7, window_bounds = array<i64: 32, 256>}]} {
    %c0_i32 = arith.constant 0 : i32
    %0 = arith.cmpi eq, %arg1, %c0_i32 : i32
    %1 = arith.extui %0 : i1 to i32
    %c0_i32_0 = arith.constant 0 : i32
    %2 = arith.cmpi ne, %1, %c0_i32_0 : i32
    scf.if %2 {
      %cst_10 = arith.constant 0.000000e+00 : f32
      %12 = vector.broadcast %cst_10 : f32 to vector<32x256xf32>
      %c0_11 = arith.constant 0 : index
      %c0_12 = arith.constant 0 : index
      %13 = vector.load %arg10[%c0_11, %c0_12] : memref<32x256xf32, #tpu.memory_space<vmem>>, vector<32x256xf32>
      tpu.vector_store %arg10[%c0_11, %c0_12], %12 {strides = array<i32>} : memref<32x256xf32, #tpu.memory_space<vmem>>, vector<32x256xf32>,
    } else {
    }
    %c0 = arith.constant 0 : index
    %c0_1 = arith.constant 0 : index
    %3 = vector.load %arg10[%c0, %c0_1] : memref<32x256xf32, #tpu.memory_space<vmem>>, vector<32x256xf32>
    %c0_2 = arith.constant 0 : index
    %c0_3 = arith.constant 0 : index
    %4 = vector.load %arg2[%c0_2, %c0_3] : memref<32x256xbf16, #tpu.memory_space<vmem>>, vector<32x256xbf16>
    %c0_4 = arith.constant 0 : index
    %c0_5 = arith.constant 0 : index
    %5 = vector.load %arg3[%c0_4, %c0_5] : memref<256x256xbf16, #tpu.memory_space<vmem>>, vector<256x256xbf16>
    %cst = arith.constant dense<0.000000e+00> : vector<32x256xf32>
    %6 = tpu.matmul %4, %5, %cst {dimension_numbers = #tpu.dot_dimension_numbers<[1], [0], [0], [1], [0, 0, 1, 1], [], []>} : vector<32x256xbf16>, vector<256x256xbf16>, vector<32x256xf32> -> vector<32x256xf32>
    %7 = arith.addf %3, %6 : vector<32x256xf32>
    %c0_6 = arith.constant 0 : index
    %c0_7 = arith.constant 0 : index
    %8 = vector.load %arg10[%c0_6, %c0_7] : memref<32x256xf32, #tpu.memory_space<vmem>>, vector<32x256xf32>
    tpu.vector_store %arg10[%c0_6, %c0_7], %7 {strides = array<i32>} : memref<32x256xf32, #tpu.memory_space<vmem>>, vector<32x256xf32>,
    %c0_i32_8 = arith.constant 0 : i32
    %9 = arith.cmpi eq, %arg1, %c0_i32_8 : i32
    %10 = arith.extui %9 : i1 to i32
    %c0_i32_9 = arith.constant 0 : i32
    %11 = arith.cmpi ne, %10, %c0_i32_9 : i32
    scf.if %11 {
      %c0_10 = arith.constant 0 : index
      %c0_11 = arith.constant 0 : index
      %12 = vector.load %arg10[%c0_10, %c0_11] : memref<32x256xf32, #tpu.memory_space<vmem>>, vector<32x256xf32>
      %c0_12 = arith.constant 0 : index
      %c0_13 = arith.constant 0 : index
      %13 = vector.load %arg4[%c0_12, %c0_13] : memref<1x256xf32, #tpu.memory_space<vmem>>, vector<1x256xf32>
      %14 = vector.broadcast %13 : vector<1x256xf32> to vector<32x256xf32>
      %15 = arith.addf %12, %14 : vector<32x256xf32>
      %16 = arith.truncf %15 : vector<32x256xf32> to vector<32x256xbf16>
      %c0_14 = arith.constant 0 : index
      %c0_15 = arith.constant 0 : index
      %17 = vector.load %arg5[%c0_14, %c0_15] : memref<256x256xbf16, #tpu.memory_space<vmem>>, vector<256x256xbf16>
      %cst_16 = arith.constant dense<0.000000e+00> : vector<32x256xf32>
      %18 = tpu.matmul %16, %17, %cst_16 {dimension_numbers = #tpu.dot_dimension_numbers<[1], [0], [0], [1], [0, 0, 1, 1], [], []>} : vector<32x256xbf16>, vector<256x256xbf16>, vector<32x256xf32> -> vector<32x256xf32>
      %c0_17 = arith.constant 0 : index
      %c0_18 = arith.constant 0 : index
      %19 = vector.load %arg6[%c0_17, %c0_18] : memref<1x256xf32, #tpu.memory_space<vmem>>, vector<1x256xf32>
      %20 = vector.broadcast %19 : vector<1x256xf32> to vector<32x256xf32>
      %21 = arith.addf %18, %20 : vector<32x256xf32>
      %cst_19 = arith.constant 0.000000e+00 : f32
      %22 = vector.broadcast %cst_19 : f32 to vector<32x256xf32>
      %23 = arith.maximumf %21, %22 : vector<32x256xf32>
      %24 = arith.truncf %23 : vector<32x256xf32> to vector<32x256xbf16>
      %c0_20 = arith.constant 0 : index
      %c0_21 = arith.constant 0 : index
      %25 = vector.load %arg7[%c0_20, %c0_21] : memref<256x256xbf16, #tpu.memory_space<vmem>>, vector<256x256xbf16>
      %cst_22 = arith.constant dense<0.000000e+00> : vector<32x256xf32>
      %26 = tpu.matmul %24, %25, %cst_22 {dimension_numbers = #tpu.dot_dimension_numbers<[1], [0], [0], [1], [0, 0, 1, 1], [], []>} : vector<32x256xbf16>, vector<256x256xbf16>, vector<32x256xf32> -> vector<32x256xf32>
      %c0_23 = arith.constant 0 : index
      %c0_24 = arith.constant 0 : index
      %27 = vector.load %arg8[%c0_23, %c0_24] : memref<1x256xf32, #tpu.memory_space<vmem>>, vector<1x256xf32>
      %28 = vector.broadcast %27 : vector<1x256xf32> to vector<32x256xf32>
      %29 = arith.addf %26, %28 : vector<32x256xf32>
      %30 = arith.mulf %29, %29 : vector<32x256xf32>
      %cst_25 = arith.constant dense<0.000000e+00> : vector<32xf32>
      %31 = vector.multi_reduction <add>, %30, %cst_25 [1] : vector<32x256xf32> to vector<32xf32>
      %32 = vector.shape_cast %31 : vector<32xf32> to vector<32x1xf32>
      %cst_26 = arith.constant 1.000000e-24 : f32
      %33 = vector.broadcast %cst_26 : f32 to vector<32x1xf32>
      %34 = arith.maximumf %32, %33 : vector<32x1xf32>
      %35 = math.rsqrt %34 : vector<32x1xf32>
      %36 = vector.broadcast %35 : vector<32x1xf32> to vector<32x256xf32>
      %37 = arith.mulf %29, %36 : vector<32x256xf32>
      %c0_27 = arith.constant 0 : index
      %c0_28 = arith.constant 0 : index
      %38 = vector.load %arg9[%c0_27, %c0_28] : memref<32x256xf32, #tpu.memory_space<vmem>>, vector<32x256xf32>
      tpu.vector_store %arg9[%c0_27, %c0_28], %37 {strides = array<i32>} : memref<32x256xf32, #tpu.memory_space<vmem>>, vector<32x256xf32>,
    } else {
    }
    return
  }
  func.func @transform_0(%arg0: i32, %arg1: i32) -> (i32, i32) {
    %c0_i32 = arith.constant 0 : i32
    return %arg0, %arg1 : i32, i32
  }
  func.func @transform_1(%arg0: i32, %arg1: i32) -> (i32, i32) {
    %c0_i32 = arith.constant 0 : i32
    %c0_i32_0 = arith.constant 0 : i32
    return %arg1, %c0_i32 : i32, i32
  }
  func.func @transform_2(%arg0: i32, %arg1: i32) -> (i32, i32) {
    %c0_i32 = arith.constant 0 : i32
    %c0_i32_0 = arith.constant 0 : i32
    %c0_i32_1 = arith.constant 0 : i32
    return %c0_i32, %c0_i32_0 : i32, i32
  }
  func.func @transform_3(%arg0: i32, %arg1: i32) -> (i32, i32) {
    %c0_i32 = arith.constant 0 : i32
    %c0_i32_0 = arith.constant 0 : i32
    %c0_i32_1 = arith.constant 0 : i32
    return %c0_i32, %c0_i32_0 : i32, i32
  }
  func.func @transform_4(%arg0: i32, %arg1: i32) -> (i32, i32) {
    %c0_i32 = arith.constant 0 : i32
    %c0_i32_0 = arith.constant 0 : i32
    %c0_i32_1 = arith.constant 0 : i32
    return %c0_i32, %c0_i32_0 : i32, i32
  }
  func.func @transform_5(%arg0: i32, %arg1: i32) -> (i32, i32) {
    %c0_i32 = arith.constant 0 : i32
    %c0_i32_0 = arith.constant 0 : i32
    %c0_i32_1 = arith.constant 0 : i32
    return %c0_i32, %c0_i32_0 : i32, i32
  }
  func.func @transform_6(%arg0: i32, %arg1: i32) -> (i32, i32) {
    %c0_i32 = arith.constant 0 : i32
    %c0_i32_0 = arith.constant 0 : i32
    %c0_i32_1 = arith.constant 0 : i32
    return %c0_i32, %c0_i32_0 : i32, i32
  }
  func.func @transform_7(%arg0: i32, %arg1: i32) -> (i32, i32) {
    %c0_i32 = arith.constant 0 : i32
    %c0_i32_0 = arith.constant 0 : i32
    return %arg0, %c0_i32 : i32, i32
  }
}

</mosaic_0001>

<bundles_post_ra>
// kernel: pretrain_inference_forward.1
= control target key start
LH: loop header
LB: loop body
LE: loop exit
PB: predicated region body
PF: predicated region fallthrough
CT: control target
= control target key end

     0   :  { %s1709_s1 = inlined_call_operand.vmem [shape: bf16[256,256], index: 1, kind: input, shape index: {}]   ;;  %s1710_s0 = inlined_call_operand.vmem [shape: bf16[32,256], index: 0, kind: input, shape index: {}]   ;;  %s1711_s3 = inlined_call_operand.vmem [shape: bf16[256,256], index: 3, kind: input, shape index: {}]   ;;  %s1712_s5 = inlined_call_operand.vmem [shape: bf16[256,256], index: 5, kind: input, shape index: {}]   ;;  %s1713_s2 = inlined_call_operand.vmem [shape: f32[1,256], index: 2, kind: input, shape index: {}]   ;;  %s1714_s4 = inlined_call_operand.vmem [shape: f32[1,256], index: 4, kind: input, shape index: {}]   ;;  %s1715_s6 = inlined_call_operand.vmem [shape: f32[1,256], index: 6, kind: input, shape index: {}]   ;;  %s1716_s7 = inlined_call_operand.vmem [shape: f32[32,256], index: 7, kind: output, shape index: {}]  }
   0x1   :  { %v1072_v0 = vld [vmem:[%s1709_s1 + $0x4] ss:$8 sps:$4 sm:$0xff]   ;;  %v1074_v1 = vld [vmem:[%s1709_s1] ss:$8 sps:$4 sm:$0xff]   ;;  %v1075_v2 = vld [vmem:[%s1709_s1 + $0x14] ss:$8 sps:$4 sm:$0xff]  }
   0x2   :  { %262 = vmatprep.subr.bf16.mxu0 %v1072_v0  ;;  %v1077_v3 = vld [vmem:[%s1709_s1 + $0x10] ss:$8 sps:$4 sm:$0xff]   ;;  %v1078_v4 = vld [vmem:[%s1709_s1 + $0x24] ss:$8 sps:$4 sm:$0xff]   ;;  %v1080_v5 = vld [vmem:[%s1709_s1 + $0x20] ss:$8 sps:$4 sm:$0xff]  }
   0x3   :  { %263 = vmatpush1.bf16.msra.mxu0 %v1074_v1  ;;  %v1081_v6 = vld [vmem:[%s1709_s1 + $0x34] ss:$8 sps:$4 sm:$0xff]   ;;  %v1083_v7 = vld [vmem:[%s1709_s1 + $0x30] ss:$8 sps:$4 sm:$0xff]   ;;  %v1084_v8 = vld [vmem:[%s1709_s1 + $0x44] ss:$8 sps:$4 sm:$0xff]  }
   0x4   :  { %264 = vmatprep.subr.bf16.mxu0 %v1075_v2  ;;  %v1086_v9 = vld [vmem:[%s1709_s1 + $0x40] ss:$8 sps:$4 sm:$0xff]   ;;  %v1087_v10 = vld [vmem:[%s1709_s1 + $0x54] ss:$8 sps:$4 sm:$0xff]   ;;  %v1089_v11 = vld [vmem:[%s1709_s1 + $0x50] ss:$8 sps:$4 sm:$0xff]  }
   0x5   :  { %v1090_v12 = vld [vmem:[%s1709_s1 + $0x64] ss:$8 sps:$4 sm:$0xff]   ;;  %v1092_v14 = vld [vmem:[%s1709_s1 + $0x60] ss:$8 sps:$4 sm:$0xff]   ;;  %v1093_v15 = vld [vmem:[%s1709_s1 + $0x74] ss:$8 sps:$4 sm:$0xff]  }
   0x6   :  { %v1122_v13 = vld [vmem:[%s1710_s0 + $0x4] ss:$8 sps:$4 sm:$0xff]   ;;  %v1128_v17 = vld [vmem:[%s1711_s3] ss:$8 sps:$4 sm:$0xff]   ;;  %v1095_v18 = vld [vmem:[%s1709_s1 + $0x70] ss:$8 sps:$4 sm:$0xff]  }
   0x7   :  { %265 = vmatpush1.bf16.msra.mxu0 %v1077_v3  ;;  %294 = vmatprep.mubr.bf16.mxu0 %v1122_v13  ;;  %v1126_v16 = vld [vmem:[%s1711_s3 + $0x4] ss:$8 sps:$4 sm:$0xff]   ;;  %v1129_v19 = vld [vmem:[%s1711_s3 + $0x14] ss:$8 sps:$4 sm:$0xff]   ;;  %v1131_v21 = vld [vmem:[%s1711_s3 + $0x10] ss:$8 sps:$4 sm:$0xff]  }
   0x8   :  { %266 = vmatprep.subr.bf16.mxu0 %v1078_v4  ;;  %570 = vmatprep.subr.bf16.mxu1 %v1126_v16  ;;  %v1096_v20 = vld [vmem:[%s1709_s1 + $0x84] ss:$8 sps:$4 sm:$0xff]   ;;  %v1098_v23 = vld [vmem:[%s1709_s1 + $0x80] ss:$8 sps:$4 sm:$0xff]   ;;  %v1099_v24 = vld [vmem:[%s1709_s1 + $0x94] ss:$8 sps:$4 sm:$0xff]  }
   0x9   :  { %571 = vmatpush1.bf16.msra.mxu1 %v1128_v17  ;;  %v1132_v22 = vld [vmem:[%s1711_s3 + $0x24] ss:$8 sps:$4 sm:$0xff]   ;;  %v1134_v25 = vld [vmem:[%s1711_s3 + $0x20] ss:$8 sps:$4 sm:$0xff]   ;;  %v1135_v26 = vld [vmem:[%s1711_s3 + $0x34] ss:$8 sps:$4 sm:$0xff]  }
   0xa   :  { %572 = vmatprep.subr.bf16.mxu1 %v1129_v19  ;;  %v1101_v27 = vld [vmem:[%s1709_s1 + $0x90] ss:$8 sps:$4 sm:$0xff]   ;;  %v1102_v28 = vld [vmem:[%s1709_s1 + $0xa4] ss:$8 sps:$4 sm:$0xff]   ;;  %v1104_v31 = vld [vmem:[%s1709_s1 + $0xa0] ss:$8 sps:$4 sm:$0xff]  }
   0xb   :  { %267 = vmatpush1.bf16.msra.mxu0 %v1080_v5  ;;  %v1137_v29 = vld [vmem:[%s1711_s3 + $0x30] ss:$8 sps:$4 sm:$0xff]   ;;  %v1138_v30 = vld [vmem:[%s1711_s3 + $0x44] ss:$8 sps:$4 sm:$0xff]   ;;  %v1105_v32 = vld [vmem:[%s1709_s1 + $0xb4] ss:$8 sps:$4 sm:$0xff]  }
   0xc   :  { %268 = vmatprep.subr.bf16.mxu0 %v1081_v6  ;;  %v1140_v33 = vld [vmem:[%s1711_s3 + $0x40] ss:$8 sps:$4 sm:$0xff]   ;;  %v1141_v34 = vld [vmem:[%s1711_s3 + $0x54] ss:$8 sps:$4 sm:$0xff]   ;;  %v1107_v35 = vld [vmem:[%s1709_s1 + $0xb0] ss:$8 sps:$4 sm:$0xff]  }
   0xd   :  { %573 = vmatpush1.bf16.msra.mxu1 %v1131_v21  ;;  %v1143_v36 = vld [vmem:[%s1711_s3 + $0x50] ss:$8 sps:$4 sm:$0xff]   ;;  %v1108_v37 = vld [vmem:[%s1709_s1 + $0xc4] ss:$8 sps:$4 sm:$0xff]   ;;  %v1110_v39 = vld [vmem:[%s1709_s1 + $0xc0] ss:$8 sps:$4 sm:$0xff]  }
   0xe   :  { %574 = vmatprep.subr.bf16.mxu1 %v1132_v22  ;;  %v1144_v38 = vld [vmem:[%s1711_s3 + $0x64] ss:$8 sps:$4 sm:$0xff]   ;;  %v1146_v40 = vld [vmem:[%s1711_s3 + $0x60] ss:$8 sps:$4 sm:$0xff]   ;;  %v1111_v41 = vld [vmem:[%s1709_s1 + $0xd4] ss:$8 sps:$4 sm:$0xff]  }
   0xf   :  { %269 = vmatpush1.bf16.msra.mxu0 %v1083_v7  ;;  %v1147_v42 = vld [vmem:[%s1711_s3 + $0x74] ss:$8 sps:$4 sm:$0xff]   ;;  %v1113_v43 = vld [vmem:[%s1709_s1 + $0xd0] ss:$8 sps:$4 sm:$0xff]   ;;  %v1114_v45 = vld [vmem:[%s1709_s1 + $0xe4] ss:$8 sps:$4 sm:$0xff]  }
  0x10   :  { %270 = vmatprep.subr.bf16.mxu0 %v1084_v8  ;;  %v1149_v44 = vld [vmem:[%s1711_s3 + $0x70] ss:$8 sps:$4 sm:$0xff]   ;;  %v1150_v46 = vld [vmem:[%s1711_s3 + $0x84] ss:$8 sps:$4 sm:$0xff]   ;;  %v1116_v47 = vld [vmem:[%s1709_s1 + $0xe0] ss:$8 sps:$4 sm:$0xff]  }
  0x11   :  { %575 = vmatpush1.bf16.msra.mxu1 %v1134_v25  ;;  %v1152_v48 = vld [vmem:[%s1711_s3 + $0x80] ss:$8 sps:$4 sm:$0xff]   ;;  %v1117_v49 = vld [vmem:[%s1709_s1 + $0xf4] ss:$8 sps:$4 sm:$0xff]   ;;  %v1119_v51 = vld [vmem:[%s1709_s1 + $0xf0] ss:$8 sps:$4 sm:$0xff]  }
  0x12   :  { %576 = vmatprep.subr.bf16.mxu1 %v1135_v26  ;;  %v1153_v50 = vld [vmem:[%s1711_s3 + $0x94] ss:$8 sps:$4 sm:$0xff]   ;;  %v1155_v52 = vld [vmem:[%s1711_s3 + $0x90] ss:$8 sps:$4 sm:$0xff]   ;;  %v1156_v53 = vld [vmem:[%s1711_s3 + $0xa4] ss:$8 sps:$4 sm:$0xff]  }
  0x13   :  { %271 = vmatpush1.bf16.msra.mxu0 %v1086_v9  ;;  %v1120_v54 = vld [vmem:[%s1710_s0] ss:$8 sps:$4 sm:$0xff]   ;;  %v1123_v55 = vld [vmem:[%s1710_s0 + $0x14] ss:$8 sps:$4 sm:$0xff]   ;;  %v1161_v58 = vld [vmem:[%s1711_s3 + $0xb0] ss:$8 sps:$4 sm:$0xff]  }
  0x14   :  { %272 = vmatprep.subr.bf16.mxu0 %v1087_v10  ;;  %v1158_v56 = vld [vmem:[%s1711_s3 + $0xa0] ss:$8 sps:$4 sm:$0xff]   ;;  %v1159_v57 = vld [vmem:[%s1711_s3 + $0xb4] ss:$8 sps:$4 sm:$0xff]   ;;  %v1162_v59 = vld [vmem:[%s1711_s3 + $0xc4] ss:$8 sps:$4 sm:$0xff]  }
  0x15   :  { %577 = vmatpush1.bf16.msra.mxu1 %v1137_v29  ;;  %v1125_v60 = vld [vmem:[%s1710_s0 + $0x10] ss:$8 sps:$4 sm:$0xff]   ;;  %v1164_v61 = vld [vmem:[%s1711_s3 + $0xc0] ss:$8 sps:$4 sm:$0xff]   ;;  %v1165_v62 = vld [vmem:[%s1711_s3 + $0xd4] ss:$8 sps:$4 sm:$0xff]  }
  0x16   :  { %578 = vmatprep.subr.bf16.mxu1 %v1138_v30  ;;  %v1167_v63 = vld [vmem:[%s1711_s3 + $0xd0] ss:$8 sps:$4 sm:$0xff]   ;;  %v1168_v0 = vld [vmem:[%s1711_s3 + $0xe4] ss:$8 sps:$4 sm:$0xff]   ;;  %v1170_v1 = vld [vmem:[%s1711_s3 + $0xe0] ss:$8 sps:$4 sm:$0xff]  }
  0x17   :  { %273 = vmatpush1.bf16.msra.mxu0 %v1089_v11  ;;  %v1171_v2 = vld [vmem:[%s1711_s3 + $0xf4] ss:$8 sps:$4 sm:$0xff]   ;;  %v1173_v3 = vld [vmem:[%s1711_s3 + $0xf0] ss:$8 sps:$4 sm:$0xff]   ;;  %v1477_v4 = vld [vmem:[%s1712_s5] ss:$8 sps:$4 sm:$0xff]  }
  0x18   :  { %274 = vmatprep.subr.bf16.mxu0 %v1090_v12  ;;  %v1176_v5 = vld [vmem:[%s1712_s5 + $0x4] ss:$8 sps:$4 sm:$0xff]   ;;  %v1485_v6 = vld [vmem:[%s1712_s5 + $0x14] ss:$8 sps:$4 sm:$0xff]   ;;  %v1491_v7 = vld [vmem:[%s1712_s5 + $0x10] ss:$8 sps:$4 sm:$0xff]  }
  0x19   :  { %579 = vmatpush1.bf16.msra.mxu1 %v1140_v33  ;;  %v1497_v8 = vld [vmem:[%s1712_s5 + $0x24] ss:$8 sps:$4 sm:$0xff]   ;;  %v1503_v9 = vld [vmem:[%s1712_s5 + $0x20] ss:$8 sps:$4 sm:$0xff]   ;;  %v1509_v10 = vld [vmem:[%s1712_s5 + $0x34] ss:$8 sps:$4 sm:$0xff]  }
  0x1a   :  { %580 = vmatprep.subr.bf16.mxu1 %v1141_v34  ;;  %v1514_v11 = vld [vmem:[%s1712_s5 + $0x30] ss:$8 sps:$4 sm:$0xff]   ;;  %v1521_v12 = vld [vmem:[%s1712_s5 + $0x44] ss:$8 sps:$4 sm:$0xff]   ;;  %v1527_v13 = vld [vmem:[%s1712_s5 + $0x40] ss:$8 sps:$4 sm:$0xff]  }
  0x1b   :  { %275 = vmatpush1.bf16.msra.mxu0 %v1092_v14  ;;  %v1533_v14 = vld [vmem:[%s1712_s5 + $0x54] ss:$8 sps:$4 sm:$0xff]   ;;  %v1545_v16 = vld [vmem:[%s1712_s5 + $0x64] ss:$8 sps:$4 sm:$0xff]   ;;  %v1551_v17 = vld [vmem:[%s1712_s5 + $0x60] ss:$8 sps:$4 sm:$0xff]  }
  0x1c   :  { %276 = vmatprep.subr.bf16.mxu0 %v1093_v15  ;;  %v1539_v15 = vld [vmem:[%s1712_s5 + $0x50] ss:$8 sps:$4 sm:$0xff]   ;;  %v1575_v21 = vld [vmem:[%s1712_s5 + $0x80] ss:$8 sps:$4 sm:$0xff]   ;;  %v1581_v22 = vld [vmem:[%s1712_s5 + $0x94] ss:$8 sps:$4 sm:$0xff]  }
  0x1d   :  { %581 = vmatpush1.bf16.msra.mxu1 %v1143_v36  ;;  %v1563_v19 = vld [vmem:[%s1712_s5 + $0x70] ss:$8 sps:$4 sm:$0xff]   ;;  %v1599_v25 = vld [vmem:[%s1712_s5 + $0xa0] ss:$8 sps:$4 sm:$0xff]   ;;  %v1605_v26 = vld [vmem:[%s1712_s5 + $0xb4] ss:$8 sps:$4 sm:$0xff]  }
  0x1e   :  { %582 = vmatprep.subr.bf16.mxu1 %v1144_v38  ;;  %v1210_v29 = vld [vmem:[%s1712_s5 + $0xc0] ss:$8 sps:$4 sm:$0xff]   ;;  %v1215_v30 = vld [vmem:[%s1712_s5 + $0xd4] ss:$8 sps:$4 sm:$0xff]  }
  0x1f   :  { %277 = vmatpush1.bf16.msra.mxu0 %v1095_v18  ;;  %v1557_v18 = vld [vmem:[%s1712_s5 + $0x74] ss:$8 sps:$4 sm:$0xff]  }
  0x20   :  { %278 = vmatprep.subr.bf16.mxu0 %v1096_v20  ;;  %v1569_v20 = vld [vmem:[%s1712_s5 + $0x84] ss:$8 sps:$4 sm:$0xff]  }
  0x21   :  { %583 = vmatpush1.bf16.msra.mxu1 %v1146_v40 }
  0x22   :  { %584 = vmatprep.subr.bf16.mxu1 %v1147_v42 }
  0x23   :  { %279 = vmatpush1.bf16.msra.mxu0 %v1098_v23  ;;  %v1587_v23 = vld [vmem:[%s1712_s5 + $0x90] ss:$8 sps:$4 sm:$0xff]  }
  0x24   :  { %280 = vmatprep.subr.bf16.mxu0 %v1099_v24  ;;  %v1593_v24 = vld [vmem:[%s1712_s5 + $0xa4] ss:$8 sps:$4 sm:$0xff]  }
  0x25   :  { %585 = vmatpush1.bf16.msra.mxu1 %v1149_v44 }
  0x26   :  { %586 = vmatprep.subr.bf16.mxu1 %v1150_v46 }
  0x27   :  { %281 = vmatpush1.bf16.msra.mxu0 %v1101_v27  ;;  %v1611_v27 = vld [vmem:[%s1712_s5 + $0xb0] ss:$8 sps:$4 sm:$0xff]  }
  0x28   :  { %282 = vmatprep.subr.bf16.mxu0 %v1102_v28  ;;  %v1617_v28 = vld [vmem:[%s1712_s5 + $0xc4] ss:$8 sps:$4 sm:$0xff]  }
  0x29   :  { %587 = vmatpush1.bf16.msra.mxu1 %v1152_v48 }
  0x2a   :  { %588 = vmatprep.subr.bf16.mxu1 %v1153_v50 }
  0x2b   :  { %283 = vmatpush1.bf16.msra.mxu0 %v1104_v31  ;;  %v1213_v31 = vld [vmem:[%s1712_s5 + $0xd0] ss:$8 sps:$4 sm:$0xff]  }
  0x2c   :  { %284 = vmatprep.subr.bf16.mxu0 %v1105_v32  ;;  %v344_v32 = vlaneseq }
  0x2d   :  { %589 = vmatpush1.bf16.msra.mxu1 %v1155_v52 }
  0x2e   :  { %590 = vmatprep.subr.bf16.mxu1 %v1156_v53  ;;  %v345_v33 = vshrl.u32 %v344_v32, 7 }
  0x2f   :  { %285 = vmatpush1.bf16.msra.mxu0 %v1107_v35  ;;  %v342_v35 = vld [vmem:[%s1713_s2] sm:$0x3] }
  0x30   :  { %286 = vmatprep.subr.bf16.mxu0 %v1108_v37  ;;  %v1630_v34 = vsub.s32 0, %v345_v33  ;;  %v1635_v36 = vsub.s32 1, %v345_v33 }
  0x31   :  { %591 = vmatpush1.bf16.msra.mxu1 %v1158_v56 }
  0x32   :  { %592 = vmatprep.subr.bf16.mxu1 %v1159_v57  ;;  %v347_v37 = vrot.slane %v342_v35, %v1630_v34 }
  0x33   :  { %287 = vmatpush1.bf16.msra.mxu0 %v1110_v39  ;;  %v351_v39 = vrot.slane %v342_v35, %v1635_v36 }
  0x34   :  { %288 = vmatprep.subr.bf16.mxu0 %v1111_v41 }
  0x35   :  { %593 = vmatpush1.bf16.msra.mxu1 %v1161_v58 }
  0x36   :  { %594 = vmatprep.subr.bf16.mxu1 %v1162_v59  ;;  %v1218_v59 = vld [vmem:[%s1712_s5 + $0xe4] ss:$8 sps:$4 sm:$0xff]  }
  0x37   :  { %289 = vmatpush1.bf16.msra.mxu0 %v1113_v43 }
  0x38   :  { %290 = vmatprep.subr.bf16.mxu0 %v1114_v45 }
  0x39   :  { %595 = vmatpush1.bf16.msra.mxu1 %v1164_v61  ;;  %v1221_v61 = vld [vmem:[%s1712_s5 + $0xf4] ss:$8 sps:$4 sm:$0xff]  }
  0x3a   :  { %596 = vmatprep.subr.bf16.mxu1 %v1165_v62  ;;  %v1219_v62 = vld [vmem:[%s1712_s5 + $0xf0] ss:$8 sps:$4 sm:$0xff]  }
  0x3b   :  { %291 = vmatpush1.bf16.msra.mxu0 %v1116_v47 }
  0x3c   :  { %292 = vmatprep.subr.bf16.mxu0 %v1117_v49 }
  0x3d   :  { %597 = vmatpush1.bf16.msra.mxu1 %v1167_v63  ;;  %v398_v63 = vld [vmem:[%s1714_s4] sm:$0x3] }
  0x3e   :  { %598 = vmatprep.subr.bf16.mxu1 %v1168_v0  ;;  %v403_v0 = vrot.slane %v398_v63, %v1630_v34 }
  0x3f   :  { %293 = vmatpush1.bf16.msra.mxu0 %v1119_v51 }
  0x40   :  { %839 = vmatprep.subr.bf16.mxu0 %v1176_v5 }
  0x41   :  { %599 = vmatpush1.bf16.msra.mxu1 %v1170_v1  ;;  %v407_v1 = vrot.slane %v398_v63, %v1635_v36 }
  0x42   :  { %295 = vmatmul.mubr.bf16.vlgmr.msra.gmra.mrb[0].mxu0 %v1120_v54  ;;  %600 = vmatprep.subr.bf16.mxu1 %v1171_v2 }
  0x43   :  { %304 = vmatprep.mubr.bf16.mxu0 %v1123_v55  ;;  %840 = vmatpush1.bf16.msra.mxu0 %v1477_v4 }
  0x44   :  { %841 = vmatprep.subr.bf16.mxu0 %v1485_v6 }
  0x45   :  { %601 = vmatpush1.bf16.msra.mxu1 %v1173_v3 }
  0x46   :  { %1040 = vmatprep.subr.bf16.mxu1 %v1176_v5 }
  0x47   :  { %842 = vmatpush1.bf16.msra.mxu0 %v1491_v7 }
  0x48   :  { %843 = vmatprep.subr.bf16.mxu0 %v1497_v8 }
  0x4a   :  { %305 = vmatmul.mubr.bf16.gmra.mrb[4].mxu0 %v1125_v60  ;;  %v1216_v60 = vld [vmem:[%s1712_s5 + $0xe0] ss:$8 sps:$4 sm:$0xff]  }
  0x4b   :  { %844 = vmatpush1.bf16.msra.mxu0 %v1503_v9 }
  0x4c   :  { %845 = vmatprep.subr.bf16.mxu0 %v1509_v10 }
  0x4f   :  { %846 = vmatpush1.bf16.msra.mxu0 %v1514_v11 }
  0x50   :  { %847 = vmatprep.subr.bf16.mxu0 %v1521_v12 }
  0x53   :  { %848 = vmatpush1.bf16.msra.mxu0 %v1527_v13 }
  0x54   :  { %849 = vmatprep.subr.bf16.mxu0 %v1533_v14 }
  0x57   :  { %850 = vmatpush1.bf16.msra.mxu0 %v1539_v15 }
  0x58   :  { %851 = vmatprep.subr.bf16.mxu0 %v1545_v16 }
  0x5b   :  { %852 = vmatpush1.bf16.msra.mxu0 %v1551_v17 }
  0x5c   :  { %853 = vmatprep.subr.bf16.mxu0 %v1557_v18 }
  0x5f   :  { %854 = vmatpush1.bf16.msra.mxu0 %v1563_v19 }
  0x60   :  { %855 = vmatprep.subr.bf16.mxu0 %v1569_v20 }
  0x63   :  { %856 = vmatpush1.bf16.msra.mxu0 %v1575_v21 }
  0x64   :  { %857 = vmatprep.subr.bf16.mxu0 %v1581_v22 }
  0x67   :  { %858 = vmatpush1.bf16.msra.mxu0 %v1587_v23 }
  0x68   :  { %859 = vmatprep.subr.bf16.mxu0 %v1593_v24 }
  0x6b   :  { %860 = vmatpush1.bf16.msra.mxu0 %v1599_v25 }
  0x6c   :  { %861 = vmatprep.subr.bf16.mxu0 %v1605_v26 }
  0x6f   :  { %862 = vmatpush1.bf16.msra.mxu0 %v1611_v27 }
  0x70   :  { %863 = vmatprep.subr.bf16.mxu0 %v1617_v28 }
  0x73   :  { %864 = vmatpush1.bf16.msra.mxu0 %v1210_v29 }
  0x74   :  { %865 = vmatprep.subr.bf16.mxu0 %v1215_v30 }
  0x77   :  { %866 = vmatpush1.bf16.msra.mxu0 %v1213_v31 }
  0x78   :  { %867 = vmatprep.subr.bf16.mxu0 %v1218_v59 }
  0x7b   :  { %868 = vmatpush1.bf16.msra.mxu0 %v1216_v60 }
  0x7c   :  { %869 = vmatprep.subr.bf16.mxu0 %v1221_v61 }
  0x7f   :  { %870 = vmatpush1.bf16.msra.mxu0 %v1219_v62 }
 0x115   :  { %v296_v38 = vpop.f32.mrb[0].mxu0 }
 0x116   :  { %v298_v40 = vpop.f32.mrb[1].mxu0  ;;  %v354_v42 = vadd.f32 %v347_v37, %v296_v38 }
 0x117   :  { %v300_v41 = vpop.f32.mrb[2].mxu0  ;;  %v355_v45 = vadd.f32 %v351_v39, %v298_v40 }
 0x118   :  { %v356_v43 = vadd.f32 %v347_v37, %v300_v41  ;;  %v302_v44 = vpop.f32.mrb[3].mxu0 }
 0x119   :  { %v357_v46 = vadd.f32 %v351_v39, %v302_v44 }
 0x11a   :  { %v362_v47 = vpack.c.bf16 %v356_v43, %v354_v42 }
 0x11b   :  { %v363_v48 = vpack.c.bf16 %v357_v46, %v355_v45 }
 0x11d   :  { %v306_v49 = vpop.f32.mrb[4].mxu0  ;;  %602 = vmatprep.mubr.bf16.mxu1 %v363_v48 }
 0x11e   :  { %v308_v50 = vpop.f32.mrb[5].mxu0  ;;  %603 = vmatmul.mubr.bf16.vlgmr.msra.gmra.mrb[0].mxu1 %v362_v47  ;;  %v358_v52 = vadd.f32 %v347_v37, %v306_v49 }
 0x11f   :  { %v310_v51 = vpop.f32.mrb[6].mxu0  ;;  %1056 = vmatpush1.bf16.msra.mxu1 %v1477_v4  ;;  %v359_v55 = vadd.f32 %v351_v39, %v308_v50 }
 0x120   :  { %v360_v53 = vadd.f32 %v347_v37, %v310_v51  ;;  %v312_v54 = vpop.f32.mrb[7].mxu0  ;;  %1041 = vmatprep.subr.bf16.mxu1 %v1485_v6 }
 0x121   :  { %v361_v56 = vadd.f32 %v351_v39, %v312_v54 }
 0x122   :  { %v364_v57 = vpack.c.bf16 %v360_v53, %v358_v52 }
 0x123   :  { %v365_v58 = vpack.c.bf16 %v361_v56, %v359_v55  ;;  %1057 = vmatpush1.bf16.msra.mxu1 %v1491_v7 }
 0x124   :  { %1042 = vmatprep.subr.bf16.mxu1 %v1497_v8 }
 0x125   :  { %612 = vmatprep.mubr.bf16.mxu1 %v365_v58 }
 0x126   :  { %613 = vmatmul.mubr.bf16.gmra.mrb[4].mxu1 %v364_v57 }
 0x127   :  { %1058 = vmatpush1.bf16.msra.mxu1 %v1503_v9 }
 0x128   :  { %1043 = vmatprep.subr.bf16.mxu1 %v1509_v10 }
 0x12b   :  { %1059 = vmatpush1.bf16.msra.mxu1 %v1514_v11 }
 0x12c   :  { %1044 = vmatprep.subr.bf16.mxu1 %v1521_v12 }
 0x12f   :  { %1060 = vmatpush1.bf16.msra.mxu1 %v1527_v13 }
 0x130   :  { %1045 = vmatprep.subr.bf16.mxu1 %v1533_v14 }
 0x133   :  { %1061 = vmatpush1.bf16.msra.mxu1 %v1539_v15 }
 0x134   :  { %1046 = vmatprep.subr.bf16.mxu1 %v1545_v16 }
 0x137   :  { %1062 = vmatpush1.bf16.msra.mxu1 %v1551_v17 }
 0x138   :  { %1047 = vmatprep.subr.bf16.mxu1 %v1557_v18 }
 0x13b   :  { %1063 = vmatpush1.bf16.msra.mxu1 %v1563_v19 }
 0x13c   :  { %1048 = vmatprep.subr.bf16.mxu1 %v1569_v20 }
 0x13f   :  { %1064 = vmatpush1.bf16.msra.mxu1 %v1575_v21 }
 0x140   :  { %1049 = vmatprep.subr.bf16.mxu1 %v1581_v22 }
 0x143   :  { %1065 = vmatpush1.bf16.msra.mxu1 %v1587_v23 }
 0x144   :  { %1050 = vmatprep.subr.bf16.mxu1 %v1593_v24 }
 0x147   :  { %1066 = vmatpush1.bf16.msra.mxu1 %v1599_v25 }
 0x148   :  { %1051 = vmatprep.subr.bf16.mxu1 %v1605_v26 }
 0x14b   :  { %1067 = vmatpush1.bf16.msra.mxu1 %v1611_v27 }
 0x14c   :  { %1052 = vmatprep.subr.bf16.mxu1 %v1617_v28 }
 0x14f   :  { %1068 = vmatpush1.bf16.msra.mxu1 %v1210_v29 }
 0x150   :  { %1053 = vmatprep.subr.bf16.mxu1 %v1215_v30  ;;  %v667_v30 = vld [vmem:[%s1715_s6] sm:$0x3] }
 0x151   :  { %v676_v32 = vrot.slane %v667_v30, %v1635_v36 }
 0x153   :  { %1069 = vmatpush1.bf16.msra.mxu1 %v1213_v31  ;;  %v672_v31 = vrot.slane %v667_v30, %v1630_v34 }
 0x154   :  { %1054 = vmatprep.subr.bf16.mxu1 %v1218_v59 }
 0x157   :  { %1070 = vmatpush1.bf16.msra.mxu1 %v1216_v60 }
 0x158   :  { %1055 = vmatprep.subr.bf16.mxu1 %v1221_v61 }
 0x15b   :  { %1071 = vmatpush1.bf16.msra.mxu1 %v1219_v62 }
 0x1f1   :  { %v604_v2 = vpop.f32.mrb[0].mxu1 }
 0x1f2   :  { %v605_v3 = vadd.f32 %v604_v2, %v403_v0  ;;  %v606_v4 = vpop.f32.mrb[1].mxu1 }
 0x1f3   :  { %v607_v5 = vadd.f32 %v606_v4, %v407_v1  ;;  %v608_v6 = vpop.f32.mrb[2].mxu1 }
 0x1f4   :  { %v609_v7 = vadd.f32 %v608_v6, %v403_v0  ;;  %v610_v8 = vpop.f32.mrb[3].mxu1  ;;  %v623_v10 = vmax.f32 %v605_v3, 0.0 }
 0x1f5   :  { %v611_v9 = vadd.f32 %v610_v8, %v407_v1  ;;  %v624_v12 = vmax.f32 %v607_v5, 0.0 }
 0x1f6   :  { %v625_v11 = vmax.f32 %v609_v7, 0.0 }
 0x1f7   :  { %v626_v13 = vmax.f32 %v611_v9, 0.0 }
 0x1f8   :  { %v631_v14 = vpack.c.bf16 %v625_v11, %v623_v10 }
 0x1f9   :  { %v632_v15 = vpack.c.bf16 %v626_v13, %v624_v12  ;;  %v614_v16 = vpop.f32.mrb[4].mxu1 }
 0x1fa   :  { %v615_v17 = vadd.f32 %v614_v16, %v403_v0  ;;  %v616_v18 = vpop.f32.mrb[5].mxu1 }
 0x1fb   :  { %v617_v19 = vadd.f32 %v616_v18, %v407_v1  ;;  %v618_v20 = vpop.f32.mrb[6].mxu1  ;;  %871 = vmatprep.mubr.bf16.mxu0 %v632_v15 }
 0x1fc   :  { %v619_v21 = vadd.f32 %v618_v20, %v403_v0  ;;  %v620_v22 = vpop.f32.mrb[7].mxu1  ;;  %872 = vmatmul.mubr.bf16.vlgmr.msra.gmra.mrb[8].mxu0 %v631_v14  ;;  %v627_v24 = vmax.f32 %v615_v17, 0.0 }
 0x1fd   :  { %v621_v23 = vadd.f32 %v620_v22, %v407_v1  ;;  %v628_v26 = vmax.f32 %v617_v19, 0.0 }
 0x1fe   :  { %v629_v25 = vmax.f32 %v619_v21, 0.0 }
 0x1ff   :  { %v630_v27 = vmax.f32 %v621_v23, 0.0 }
 0x200   :  { %v633_v28 = vpack.c.bf16 %v629_v25, %v627_v24 }
 0x201   :  { %v634_v29 = vpack.c.bf16 %v630_v27, %v628_v26 }
 0x203   :  { %881 = vmatprep.mubr.bf16.mxu1 %v634_v29 }
 0x204   :  { %882 = vmatmul.mubr.bf16.vlgmr.msra.gmra.mrb[8].mxu1 %v633_v28 }
 0x2cf   :  { %v873_v33 = vpop.f32.mrb[8].mxu0 }
 0x2d0   :  { %v874_v35 = vadd.f32 %v873_v33, %v672_v31  ;;  %v875_v37 = vpop.f32.mrb[9].mxu0 }
 0x2d1   :  { %v876_v38 = vadd.f32 %v875_v37, %v676_v32  ;;  %v877_v39 = vpop.f32.mrb[10].mxu0 }
 0x2d2   :  { %v878_v40 = vadd.f32 %v877_v39, %v672_v31  ;;  %v879_v41 = vpop.f32.mrb[11].mxu0  ;;  %v892_v42 = vmul.f32 %v874_v35, %v874_v35 }
 0x2d3   :  { %v880_v43 = vadd.f32 %v879_v41, %v676_v32  ;;  %v893_v44 = vmul.f32 %v876_v38, %v876_v38 }
 0x2d4   :  { %v894_v45 = vmul.f32 %v878_v40, %v878_v40 }
 0x2d5   :  { %v895_v46 = vmul.f32 %v880_v43, %v880_v43  ;;  %v900_v47 = vadd.f32 %v893_v44, %v892_v42 }
 0x2d7   :  { %901 = vadd.xlane.f32.xlu0 %v900_v47  ;;  %v883_v48 = vpop.f32.mrb[8].mxu1  ;;  %v903_v36 = vadd.f32 %v895_v46, %v894_v45 }
 0x2d8   :  { %v884_v49 = vadd.f32 %v883_v48, %v672_v31  ;;  %v885_v50 = vpop.f32.mrb[9].mxu1 }
 0x2d9   :  { %v886_v34 = vadd.f32 %v885_v50, %v676_v32  ;;  %v887_v51 = vpop.f32.mrb[10].mxu1 }
 0x2da   :  { %v888_v52 = vadd.f32 %v887_v51, %v672_v31  ;;  %v889_v53 = vpop.f32.mrb[11].mxu1  ;;  %v896_v54 = vmul.f32 %v884_v49, %v884_v49 }
 0x2db   :  { %v890_v55 = vadd.f32 %v889_v53, %v676_v32  ;;  %904 = vadd.xlane.f32.xlu0 %v903_v36  ;;  %v897_v56 = vmul.f32 %v886_v34, %v886_v34 }
 0x2dc   :  { %v898_v57 = vmul.f32 %v888_v52, %v888_v52 }
 0x2dd   :  { %v899_v58 = vmul.f32 %v890_v55, %v890_v55  ;;  %v906_v59 = vadd.f32 %v897_v56, %v896_v54 }
 0x2df   :  { %907 = vadd.xlane.f32.xlu1 %v906_v59  ;;  %v909_v60 = vadd.f32 %v899_v58, %v898_v57 }
 0x2e3   :  { %910 = vadd.xlane.f32.xlu1 %v909_v60 }
 0x364   :  { %v902_v61 = vpop.xlane.xlu0 %901 }
 0x365   :  { %v912_v62 = vmax.f32 %v902_v61, 1e-24 }
 0x367   :  { %1222 = vrsqrt.f32 %v912_v62 }
 0x368   :  { %v905_v63 = vpop.xlane.xlu0 %904 }
 0x369   :  { %v913_v0 = vmax.f32 %v905_v63, 1e-24 }
 0x36b   :  { %1224 = vrsqrt.f32 %v913_v0 }
 0x36c   :  { %v908_v1 = vpop.xlane.xlu1 %907 }
 0x36d   :  { %v914_v2 = vmax.f32 %v908_v1, 1e-24 }
 0x36f   :  { %1226 = vrsqrt.f32 %v914_v2 }
 0x370   :  { %v911_v3 = vpop.xlane.xlu1 %910 }
 0x371   :  { %v1223_v4 = vpop.eup %1222  ;;  %v915_v5 = vmax.f32 %v911_v3, 1e-24 }
 0x372   :  { %v920_v6 = vmul.f32 %v1223_v4, %v874_v35  ;;  %v921_v7 = vmul.f32 %v1223_v4, %v876_v38 }
 0x373   :  { %1228 = vrsqrt.f32 %v915_v5 }
 0x374   :  { %928 = vst [vmem:[%s1716_s7] sm:$0xff] %v920_v6  ;;  %929 = vst [vmem:[%s1716_s7 + $0x8] sm:$0xff] %v921_v7 }
 0x375   :  { %v1225_v8 = vpop.eup %1224 }
 0x376   :  { %v922_v9 = vmul.f32 %v1225_v8, %v878_v40  ;;  %v923_v10 = vmul.f32 %v1225_v8, %v880_v43 }
 0x378   :  { %930 = vst [vmem:[%s1716_s7 + $0x10] sm:$0xff] %v922_v9  ;;  %931 = vst [vmem:[%s1716_s7 + $0x18] sm:$0xff] %v923_v10 }
 0x379   :  { %v1227_v11 = vpop.eup %1226 }
 0x37a   :  { %v924_v12 = vmul.f32 %v1227_v11, %v884_v49  ;;  %v925_v13 = vmul.f32 %v1227_v11, %v886_v34 }
 0x37c   :  { %932 = vst [vmem:[%s1716_s7 + $0x20] sm:$0xff] %v924_v12  ;;  %933 = vst [vmem:[%s1716_s7 + $0x28] sm:$0xff] %v925_v13 }
 0x37d   :  { %v1229_v14 = vpop.eup %1228 }
 0x37e   :  { %v926_v15 = vmul.f32 %v1229_v14, %v888_v52  ;;  %v927_v16 = vmul.f32 %v1229_v14, %v890_v55 }
 0x380   :  { %934 = vst [vmem:[%s1716_s7 + $0x30] sm:$0xff] %v926_v15  ;;  %935 = vst [vmem:[%s1716_s7 + $0x38] sm:$0xff] %v927_v16 }

// kernel: pretrain_inference_forward.1
= control target key start
LH: loop header
LB: loop body
LE: loop exit
PB: predicated region body
PF: predicated region fallthrough
CT: control target
= control target key end

     0   :  { %s1709_s1 = inlined_call_operand.vmem [shape: bf16[256,256], index: 1, kind: input, shape index: {}]   ;;  %s1710_s0 = inlined_call_operand.vmem [shape: bf16[32,256], index: 0, kind: input, shape index: {}]   ;;  %s1711_s3 = inlined_call_operand.vmem [shape: bf16[256,256], index: 3, kind: input, shape index: {}]   ;;  %s1712_s5 = inlined_call_operand.vmem [shape: bf16[256,256], index: 5, kind: input, shape index: {}]   ;;  %s1713_s2 = inlined_call_operand.vmem [shape: f32[1,256], index: 2, kind: input, shape index: {}]   ;;  %s1714_s4 = inlined_call_operand.vmem [shape: f32[1,256], index: 4, kind: input, shape index: {}]   ;;  %s1715_s6 = inlined_call_operand.vmem [shape: f32[1,256], index: 6, kind: input, shape index: {}]   ;;  %s1716_s7 = inlined_call_operand.vmem [shape: f32[32,256], index: 7, kind: output, shape index: {}]  }
   0x1   :  { %v1072_v0 = vld [vmem:[%s1709_s1 + $0x4] ss:$8 sps:$4 sm:$0xff]   ;;  %v1074_v1 = vld [vmem:[%s1709_s1] ss:$8 sps:$4 sm:$0xff]   ;;  %v1075_v2 = vld [vmem:[%s1709_s1 + $0x14] ss:$8 sps:$4 sm:$0xff]  }
   0x2   :  { %262 = vmatprep.subr.bf16.mxu0 %v1072_v0  ;;  %v1077_v3 = vld [vmem:[%s1709_s1 + $0x10] ss:$8 sps:$4 sm:$0xff]   ;;  %v1078_v4 = vld [vmem:[%s1709_s1 + $0x24] ss:$8 sps:$4 sm:$0xff]   ;;  %v1080_v5 = vld [vmem:[%s1709_s1 + $0x20] ss:$8 sps:$4 sm:$0xff]  }
   0x3   :  { %263 = vmatpush1.bf16.msra.mxu0 %v1074_v1  ;;  %v1081_v6 = vld [vmem:[%s1709_s1 + $0x34] ss:$8 sps:$4 sm:$0xff]   ;;  %v1083_v7 = vld [vmem:[%s1709_s1 + $0x30] ss:$8 sps:$4 sm:$0xff]   ;;  %v1084_v8 = vld [vmem:[%s1709_s1 + $0x44] ss:$8 sps:$4 sm:$0xff]  }
   0x4   :  { %264 = vmatprep.subr.bf16.mxu0 %v1075_v2  ;;  %v1086_v9 = vld [vmem:[%s1709_s1 + $0x40] ss:$8 sps:$4 sm:$0xff]   ;;  %v1087_v10 = vld [vmem:[%s1709_s1 + $0x54] ss:$8 sps:$4 sm:$0xff]   ;;  %v1089_v11 = vld [vmem:[%s1709_s1 + $0x50] ss:$8 sps:$4 sm:$0xff]  }
   0x5   :  { %v1090_v12 = vld [vmem:[%s1709_s1 + $0x64] ss:$8 sps:$4 sm:$0xff]   ;;  %v1092_v14 = vld [vmem:[%s1709_s1 + $0x60] ss:$8 sps:$4 sm:$0xff]   ;;  %v1093_v15 = vld [vmem:[%s1709_s1 + $0x74] ss:$8 sps:$4 sm:$0xff]  }
   0x6   :  { %v1122_v13 = vld [vmem:[%s1710_s0 + $0x4] ss:$8 sps:$4 sm:$0xff]   ;;  %v1128_v17 = vld [vmem:[%s1711_s3] ss:$8 sps:$4 sm:$0xff]   ;;  %v1095_v18 = vld [vmem:[%s1709_s1 + $0x70] ss:$8 sps:$4 sm:$0xff]  }
   0x7   :  { %265 = vmatpush1.bf16.msra.mxu0 %v1077_v3  ;;  %294 = vmatprep.mubr.bf16.mxu0 %v1122_v13  ;;  %v1126_v16 = vld [vmem:[%s1711_s3 + $0x4] ss:$8 sps:$4 sm:$0xff]   ;;  %v1129_v19 = vld [vmem:[%s1711_s3 + $0x14] ss:$8 sps:$4 sm:$0xff]   ;;  %v1131_v21 = vld [vmem:[%s1711_s3 + $0x10] ss:$8 sps:$4 sm:$0xff]  }
   0x8   :  { %266 = vmatprep.subr.bf16.mxu0 %v1078_v4  ;;  %570 = vmatprep.subr.bf16.mxu1 %v1126_v16  ;;  %v1096_v20 = vld [vmem:[%s1709_s1 + $0x84] ss:$8 sps:$4 sm:$0xff]   ;;  %v1098_v23 = vld [vmem:[%s1709_s1 + $0x80] ss:$8 sps:$4 sm:$0xff]   ;;  %v1099_v24 = vld [vmem:[%s1709_s1 + $0x94] ss:$8 sps:$4 sm:$0xff]  }
   0x9   :  { %571 = vmatpush1.bf16.msra.mxu1 %v1128_v17  ;;  %v1132_v22 = vld [vmem:[%s1711_s3 + $0x24] ss:$8 sps:$4 sm:$0xff]   ;;  %v1134_v25 = vld [vmem:[%s1711_s3 + $0x20] ss:$8 sps:$4 sm:$0xff]   ;;  %v1135_v26 = vld [vmem:[%s1711_s3 + $0x34] ss:$8 sps:$4 sm:$0xff]  }
   0xa   :  { %572 = vmatprep.subr.bf16.mxu1 %v1129_v19  ;;  %v1101_v27 = vld [vmem:[%s1709_s1 + $0x90] ss:$8 sps:$4 sm:$0xff]   ;;  %v1102_v28 = vld [vmem:[%s1709_s1 + $0xa4] ss:$8 sps:$4 sm:$0xff]   ;;  %v1104_v31 = vld [vmem:[%s1709_s1 + $0xa0] ss:$8 sps:$4 sm:$0xff]  }
   0xb   :  { %267 = vmatpush1.bf16.msra.mxu0 %v1080_v5  ;;  %v1137_v29 = vld [vmem:[%s1711_s3 + $0x30] ss:$8 sps:$4 sm:$0xff]   ;;  %v1138_v30 = vld [vmem:[%s1711_s3 + $0x44] ss:$8 sps:$4 sm:$0xff]   ;;  %v1105_v32 = vld [vmem:[%s1709_s1 + $0xb4] ss:$8 sps:$4 sm:$0xff]  }
   0xc   :  { %268 = vmatprep.subr.bf16.mxu0 %v1081_v6  ;;  %v1140_v33 = vld [vmem:[%s1711_s3 + $0x40] ss:$8 sps:$4 sm:$0xff]   ;;  %v1141_v34 = vld [vmem:[%s1711_s3 + $0x54] ss:$8 sps:$4 sm:$0xff]   ;;  %v1107_v35 = vld [vmem:[%s1709_s1 + $0xb0] ss:$8 sps:$4 sm:$0xff]  }
   0xd   :  { %573 = vmatpush1.bf16.msra.mxu1 %v1131_v21  ;;  %v1143_v36 = vld [vmem:[%s1711_s3 + $0x50] ss:$8 sps:$4 sm:$0xff]   ;;  %v1108_v37 = vld [vmem:[%s1709_s1 + $0xc4] ss:$8 sps:$4 sm:$0xff]   ;;  %v1110_v39 = vld [vmem:[%s1709_s1 + $0xc0] ss:$8 sps:$4 sm:$0xff]  }
   0xe   :  { %574 = vmatprep.subr.bf16.mxu1 %v1132_v22  ;;  %v1144_v38 = vld [vmem:[%s1711_s3 + $0x64] ss:$8 sps:$4 sm:$0xff]   ;;  %v1146_v40 = vld [vmem:[%s1711_s3 + $0x60] ss:$8 sps:$4 sm:$0xff]   ;;  %v1111_v41 = vld [vmem:[%s1709_s1 + $0xd4] ss:$8 sps:$4 sm:$0xff]  }
   0xf   :  { %269 = vmatpush1.bf16.msra.mxu0 %v1083_v7  ;;  %v1147_v42 = vld [vmem:[%s1711_s3 + $0x74] ss:$8 sps:$4 sm:$0xff]   ;;  %v1113_v43 = vld [vmem:[%s1709_s1 + $0xd0] ss:$8 sps:$4 sm:$0xff]   ;;  %v1114_v45 = vld [vmem:[%s1709_s1 + $0xe4] ss:$8 sps:$4 sm:$0xff]  }
  0x10   :  { %270 = vmatprep.subr.bf16.mxu0 %v1084_v8  ;;  %v1149_v44 = vld [vmem:[%s1711_s3 + $0x70] ss:$8 sps:$4 sm:$0xff]   ;;  %v1150_v46 = vld [vmem:[%s1711_s3 + $0x84] ss:$8 sps:$4 sm:$0xff]   ;;  %v1116_v47 = vld [vmem:[%s1709_s1 + $0xe0] ss:$8 sps:$4 sm:$0xff]  }
  0x11   :  { %575 = vmatpush1.bf16.msra.mxu1 %v1134_v25  ;;  %v1152_v48 = vld [vmem:[%s1711_s3 + $0x80] ss:$8 sps:$4 sm:$0xff]   ;;  %v1117_v49 = vld [vmem:[%s1709_s1 + $0xf4] ss:$8 sps:$4 sm:$0xff]   ;;  %v1119_v51 = vld [vmem:[%s1709_s1 + $0xf0] ss:$8 sps:$4 sm:$0xff]  }
  0x12   :  { %576 = vmatprep.subr.bf16.mxu1 %v1135_v26  ;;  %v1153_v50 = vld [vmem:[%s1711_s3 + $0x94] ss:$8 sps:$4 sm:$0xff]   ;;  %v1155_v52 = vld [vmem:[%s1711_s3 + $0x90] ss:$8 sps:$4 sm:$0xff]   ;;  %v1156_v53 = vld [vmem:[%s1711_s3 + $0xa4] ss:$8 sps:$4 sm:$0xff]  }
  0x13   :  { %271 = vmatpush1.bf16.msra.mxu0 %v1086_v9  ;;  %v1120_v54 = vld [vmem:[%s1710_s0] ss:$8 sps:$4 sm:$0xff]   ;;  %v1123_v55 = vld [vmem:[%s1710_s0 + $0x14] ss:$8 sps:$4 sm:$0xff]   ;;  %v1161_v58 = vld [vmem:[%s1711_s3 + $0xb0] ss:$8 sps:$4 sm:$0xff]  }
  0x14   :  { %272 = vmatprep.subr.bf16.mxu0 %v1087_v10  ;;  %v1158_v56 = vld [vmem:[%s1711_s3 + $0xa0] ss:$8 sps:$4 sm:$0xff]   ;;  %v1159_v57 = vld [vmem:[%s1711_s3 + $0xb4] ss:$8 sps:$4 sm:$0xff]   ;;  %v1162_v59 = vld [vmem:[%s1711_s3 + $0xc4] ss:$8 sps:$4 sm:$0xff]  }
  0x15   :  { %577 = vmatpush1.bf16.msra.mxu1 %v1137_v29  ;;  %v1125_v60 = vld [vmem:[%s1710_s0 + $0x10] ss:$8 sps:$4 sm:$0xff]   ;;  %v1164_v61 = vld [vmem:[%s1711_s3 + $0xc0] ss:$8 sps:$4 sm:$0xff]   ;;  %v1165_v62 = vld [vmem:[%s1711_s3 + $0xd4] ss:$8 sps:$4 sm:$0xff]  }
  0x16   :  { %578 = vmatprep.subr.bf16.mxu1 %v1138_v30  ;;  %v1167_v63 = vld [vmem:[%s1711_s3 + $0xd0] ss:$8 sps:$4 sm:$0xff]   ;;  %v1168_v0 = vld [vmem:[%s1711_s3 + $0xe4] ss:$8 sps:$4 sm:$0xff]   ;;  %v1170_v1 = vld [vmem:[%s1711_s3 + $0xe0] ss:$8 sps:$4 sm:$0xff]  }
  0x17   :  { %273 = vmatpush1.bf16.msra.mxu0 %v1089_v11  ;;  %v1171_v2 = vld [vmem:[%s1711_s3 + $0xf4] ss:$8 sps:$4 sm:$0xff]   ;;  %v1173_v3 = vld [vmem:[%s1711_s3 + $0xf0] ss:$8 sps:$4 sm:$0xff]   ;;  %v1477_v4 = vld [vmem:[%s1712_s5] ss:$8 sps:$4 sm:$0xff]  }
  0x18   :  { %274 = vmatprep.subr.bf16.mxu0 %v1090_v12  ;;  %v1176_v5 = vld [vmem:[%s1712_s5 + $0x4] ss:$8 sps:$4 sm:$0xff]   ;;  %v1485_v6 = vld [vmem:[%s1712_s5 + $0x14] ss:$8 sps:$4 sm:$0xff]   ;;  %v1491_v7 = vld [vmem:[%s1712_s5 + $0x10] ss:$8 sps:$4 sm:$0xff]  }
  0x19   :  { %579 = vmatpush1.bf16.msra.mxu1 %v1140_v33  ;;  %v1497_v8 = vld [vmem:[%s1712_s5 + $0x24] ss:$8 sps:$4 sm:$0xff]   ;;  %v1503_v9 = vld [vmem:[%s1712_s5 + $0x20] ss:$8 sps:$4 sm:$0xff]   ;;  %v1509_v10 = vld [vmem:[%s1712_s5 + $0x34] ss:$8 sps:$4 sm:$0xff]  }
  0x1a   :  { %580 = vmatprep.subr.bf16.mxu1 %v1141_v34  ;;  %v1514_v11 = vld [vmem:[%s1712_s5 + $0x30] ss:$8 sps:$4 sm:$0xff]   ;;  %v1521_v12 = vld [vmem:[%s1712_s5 + $0x44] ss:$8 sps:$4 sm:$0xff]   ;;  %v1527_v13 = vld [vmem:[%s1712_s5 + $0x40] ss:$8 sps:$4 sm:$0xff]  }
  0x1b   :  { %275 = vmatpush1.bf16.msra.mxu0 %v1092_v14  ;;  %v1533_v14 = vld [vmem:[%s1712_s5 + $0x54] ss:$8 sps:$4 sm:$0xff]   ;;  %v1545_v16 = vld [vmem:[%s1712_s5 + $0x64] ss:$8 sps:$4 sm:$0xff]   ;;  %v1551_v17 = vld [vmem:[%s1712_s5 + $0x60] ss:$8 sps:$4 sm:$0xff]  }
  0x1c   :  { %276 = vmatprep.subr.bf16.mxu0 %v1093_v15  ;;  %v1539_v15 = vld [vmem:[%s1712_s5 + $0x50] ss:$8 sps:$4 sm:$0xff]   ;;  %v1575_v21 = vld [vmem:[%s1712_s5 + $0x80] ss:$8 sps:$4 sm:$0xff]   ;;  %v1581_v22 = vld [vmem:[%s1712_s5 + $0x94] ss:$8 sps:$4 sm:$0xff]  }
  0x1d   :  { %581 = vmatpush1.bf16.msra.mxu1 %v1143_v36  ;;  %v1563_v19 = vld [vmem:[%s1712_s5 + $0x70] ss:$8 sps:$4 sm:$0xff]   ;;  %v1599_v25 = vld [vmem:[%s1712_s5 + $0xa0] ss:$8 sps:$4 sm:$0xff]   ;;  %v1605_v26 = vld [vmem:[%s1712_s5 + $0xb4] ss:$8 sps:$4 sm:$0xff]  }
  0x1e   :  { %582 = vmatprep.subr.bf16.mxu1 %v1144_v38  ;;  %v1210_v29 = vld [vmem:[%s1712_s5 + $0xc0] ss:$8 sps:$4 sm:$0xff]   ;;  %v1215_v30 = vld [vmem:[%s1712_s5 + $0xd4] ss:$8 sps:$4 sm:$0xff]  }
  0x1f   :  { %277 = vmatpush1.bf16.msra.mxu0 %v1095_v18  ;;  %v1557_v18 = vld [vmem:[%s1712_s5 + $0x74] ss:$8 sps:$4 sm:$0xff]  }
  0x20   :  { %278 = vmatprep.subr.bf16.mxu0 %v1096_v20  ;;  %v1569_v20 = vld [vmem:[%s1712_s5 + $0x84] ss:$8 sps:$4 sm:$0xff]  }
  0x21   :  { %583 = vmatpush1.bf16.msra.mxu1 %v1146_v40 }
  0x22   :  { %584 = vmatprep.subr.bf16.mxu1 %v1147_v42 }
  0x23   :  { %279 = vmatpush1.bf16.msra.mxu0 %v1098_v23  ;;  %v1587_v23 = vld [vmem:[%s1712_s5 + $0x90] ss:$8 sps:$4 sm:$0xff]  }
  0x24   :  { %280 = vmatprep.subr.bf16.mxu0 %v1099_v24  ;;  %v1593_v24 = vld [vmem:[%s1712_s5 + $0xa4] ss:$8 sps:$4 sm:$0xff]  }
  0x25   :  { %585 = vmatpush1.bf16.msra.mxu1 %v1149_v44 }
  0x26   :  { %586 = vmatprep.subr.bf16.mxu1 %v1150_v46 }
  0x27   :  { %281 = vmatpush1.bf16.msra.mxu0 %v1101_v27  ;;  %v1611_v27 = vld [vmem:[%s1712_s5 + $0xb0] ss:$8 sps:$4 sm:$0xff]  }
  0x28   :  { %282 = vmatprep.subr.bf16.mxu0 %v1102_v28  ;;  %v1617_v28 = vld [vmem:[%s1712_s5 + $0xc4] ss:$8 sps:$4 sm:$0xff]  }
  0x29   :  { %587 = vmatpush1.bf16.msra.mxu1 %v1152_v48 }
  0x2a   :  { %588 = vmatprep.subr.bf16.mxu1 %v1153_v50 }
  0x2b   :  { %283 = vmatpush1.bf16.msra.mxu0 %v1104_v31  ;;  %v1213_v31 = vld [vmem:[%s1712_s5 + $0xd0] ss:$8 sps:$4 sm:$0xff]  }
  0x2c   :  { %284 = vmatprep.subr.bf16.mxu0 %v1105_v32  ;;  %v344_v32 = vlaneseq }
  0x2d   :  { %589 = vmatpush1.bf16.msra.mxu1 %v1155_v52 }
  0x2e   :  { %590 = vmatprep.subr.bf16.mxu1 %v1156_v53  ;;  %v345_v33 = vshrl.u32 %v344_v32, 7 }
  0x2f   :  { %285 = vmatpush1.bf16.msra.mxu0 %v1107_v35  ;;  %v342_v35 = vld [vmem:[%s1713_s2] sm:$0x3] }
  0x30   :  { %286 = vmatprep.subr.bf16.mxu0 %v1108_v37  ;;  %v1630_v34 = vsub.s32 0, %v345_v33  ;;  %v1635_v36 = vsub.s32 1, %v345_v33 }
  0x31   :  { %591 = vmatpush1.bf16.msra.mxu1 %v1158_v56 }
  0x32   :  { %592 = vmatprep.subr.bf16.mxu1 %v1159_v57  ;;  %v347_v37 = vrot.slane %v342_v35, %v1630_v34 }
  0x33   :  { %287 = vmatpush1.bf16.msra.mxu0 %v1110_v39  ;;  %v351_v39 = vrot.slane %v342_v35, %v1635_v36 }
  0x34   :  { %288 = vmatprep.subr.bf16.mxu0 %v1111_v41 }
  0x35   :  { %593 = vmatpush1.bf16.msra.mxu1 %v1161_v58 }
  0x36   :  { %594 = vmatprep.subr.bf16.mxu1 %v1162_v59  ;;  %v1218_v59 = vld [vmem:[%s1712_s5 + $0xe4] ss:$8 sps:$4 sm:$0xff]  }
  0x37   :  { %289 = vmatpush1.bf16.msra.mxu0 %v1113_v43 }
  0x38   :  { %290 = vmatprep.subr.bf16.mxu0 %v1114_v45 }
  0x39   :  { %595 = vmatpush1.bf16.msra.mxu1 %v1164_v61  ;;  %v1221_v61 = vld [vmem:[%s1712_s5 + $0xf4] ss:$8 sps:$4 sm:$0xff]  }
  0x3a   :  { %596 = vmatprep.subr.bf16.mxu1 %v1165_v62  ;;  %v1219_v62 = vld [vmem:[%s1712_s5 + $0xf0] ss:$8 sps:$4 sm:$0xff]  }
  0x3b   :  { %291 = vmatpush1.bf16.msra.mxu0 %v1116_v47 }
  0x3c   :  { %292 = vmatprep.subr.bf16.mxu0 %v1117_v49 }
  0x3d   :  { %597 = vmatpush1.bf16.msra.mxu1 %v1167_v63  ;;  %v398_v63 = vld [vmem:[%s1714_s4] sm:$0x3] }
  0x3e   :  { %598 = vmatprep.subr.bf16.mxu1 %v1168_v0  ;;  %v403_v0 = vrot.slane %v398_v63, %v1630_v34 }
  0x3f   :  { %293 = vmatpush1.bf16.msra.mxu0 %v1119_v51 }
  0x40   :  { %839 = vmatprep.subr.bf16.mxu0 %v1176_v5 }
  0x41   :  { %599 = vmatpush1.bf16.msra.mxu1 %v1170_v1  ;;  %v407_v1 = vrot.slane %v398_v63, %v1635_v36 }
  0x42   :  { %295 = vmatmul.mubr.bf16.vlgmr.msra.gmra.mrb[0].mxu0 %v1120_v54  ;;  %600 = vmatprep.subr.bf16.mxu1 %v1171_v2 }
  0x43   :  { %304 = vmatprep.mubr.bf16.mxu0 %v1123_v55  ;;  %840 = vmatpush1.bf16.msra.mxu0 %v1477_v4 }
  0x44   :  { %841 = vmatprep.subr.bf16.mxu0 %v1485_v6 }
  0x45   :  { %601 = vmatpush1.bf16.msra.mxu1 %v1173_v3 }
  0x46   :  { %1040 = vmatprep.subr.bf16.mxu1 %v1176_v5 }
  0x47   :  { %842 = vmatpush1.bf16.msra.mxu0 %v1491_v7 }
  0x48   :  { %843 = vmatprep.subr.bf16.mxu0 %v1497_v8 }
  0x4a   :  { %305 = vmatmul.mubr.bf16.gmra.mrb[4].mxu0 %v1125_v60  ;;  %v1216_v60 = vld [vmem:[%s1712_s5 + $0xe0] ss:$8 sps:$4 sm:$0xff]  }
  0x4b   :  { %844 = vmatpush1.bf16.msra.mxu0 %v1503_v9 }
  0x4c   :  { %845 = vmatprep.subr.bf16.mxu0 %v1509_v10 }
  0x4f   :  { %846 = vmatpush1.bf16.msra.mxu0 %v1514_v11 }
  0x50   :  { %847 = vmatprep.subr.bf16.mxu0 %v1521_v12 }
  0x53   :  { %848 = vmatpush1.bf16.msra.mxu0 %v1527_v13 }
  0x54   :  { %849 = vmatprep.subr.bf16.mxu0 %v1533_v14 }
  0x57   :  { %850 = vmatpush1.bf16.msra.mxu0 %v1539_v15 }
  0x58   :  { %851 = vmatprep.subr.bf16.mxu0 %v1545_v16 }
  0x5b   :  { %852 = vmatpush1.bf16.msra.mxu0 %v1551_v17 }
  0x5c   :  { %853 = vmatprep.subr.bf16.mxu0 %v1557_v18 }
  0x5f   :  { %854 = vmatpush1.bf16.msra.mxu0 %v1563_v19 }
  0x60   :  { %855 = vmatprep.subr.bf16.mxu0 %v1569_v20 }
  0x63   :  { %856 = vmatpush1.bf16.msra.mxu0 %v1575_v21 }
  0x64   :  { %857 = vmatprep.subr.bf16.mxu0 %v1581_v22 }
  0x67   :  { %858 = vmatpush1.bf16.msra.mxu0 %v1587_v23 }
  0x68   :  { %859 = vmatprep.subr.bf16.mxu0 %v1593_v24 }
  0x6b   :  { %860 = vmatpush1.bf16.msra.mxu0 %v1599_v25 }
  0x6c   :  { %861 = vmatprep.subr.bf16.mxu0 %v1605_v26 }
  0x6f   :  { %862 = vmatpush1.bf16.msra.mxu0 %v1611_v27 }
  0x70   :  { %863 = vmatprep.subr.bf16.mxu0 %v1617_v28 }
  0x73   :  { %864 = vmatpush1.bf16.msra.mxu0 %v1210_v29 }
  0x74   :  { %865 = vmatprep.subr.bf16.mxu0 %v1215_v30 }
  0x77   :  { %866 = vmatpush1.bf16.msra.mxu0 %v1213_v31 }
  0x78   :  { %867 = vmatprep.subr.bf16.mxu0 %v1218_v59 }
  0x7b   :  { %868 = vmatpush1.bf16.msra.mxu0 %v1216_v60 }
  0x7c   :  { %869 = vmatprep.subr.bf16.mxu0 %v1221_v61 }
  0x7f   :  { %870 = vmatpush1.bf16.msra.mxu0 %v1219_v62 }
 0x115   :  { %v296_v38 = vpop.f32.mrb[0].mxu0 }
 0x116   :  { %v298_v40 = vpop.f32.mrb[1].mxu0  ;;  %v354_v42 = vadd.f32 %v347_v37, %v296_v38 }
 0x117   :  { %v300_v41 = vpop.f32.mrb[2].mxu0  ;;  %v355_v45 = vadd.f32 %v351_v39, %v298_v40 }
 0x118   :  { %v356_v43 = vadd.f32 %v347_v37, %v300_v41  ;;  %v302_v44 = vpop.f32.mrb[3].mxu0 }
 0x119   :  { %v357_v46 = vadd.f32 %v351_v39, %v302_v44 }
 0x11a   :  { %v362_v47 = vpack.c.bf16 %v356_v43, %v354_v42 }
 0x11b   :  { %v363_v48 = vpack.c.bf16 %v357_v46, %v355_v45 }
 0x11d   :  { %v306_v49 = vpop.f32.mrb[4].mxu0  ;;  %602 = vmatprep.mubr.bf16.mxu1 %v363_v48 }
 0x11e   :  { %v308_v50 = vpop.f32.mrb[5].mxu0  ;;  %603 = vmatmul.mubr.bf16.vlgmr.msra.gmra.mrb[0].mxu1 %v362_v47  ;;  %v358_v52 = vadd.f32 %v347_v37, %v306_v49 }
 0x11f   :  { %v310_v51 = vpop.f32.mrb[6].mxu0  ;;  %1056 = vmatpush1.bf16.msra.mxu1 %v1477_v4  ;;  %v359_v55 = vadd.f32 %v351_v39, %v308_v50 }
 0x120   :  { %v360_v53 = vadd.f32 %v347_v37, %v310_v51  ;;  %v312_v54 = vpop.f32.mrb[7].mxu0  ;;  %1041 = vmatprep.subr.bf16.mxu1 %v1485_v6 }
 0x121   :  { %v361_v56 = vadd.f32 %v351_v39, %v312_v54 }
 0x122   :  { %v364_v57 = vpack.c.bf16 %v360_v53, %v358_v52 }
 0x123   :  { %v365_v58 = vpack.c.bf16 %v361_v56, %v359_v55  ;;  %1057 = vmatpush1.bf16.msra.mxu1 %v1491_v7 }
 0x124   :  { %1042 = vmatprep.subr.bf16.mxu1 %v1497_v8 }
 0x125   :  { %612 = vmatprep.mubr.bf16.mxu1 %v365_v58 }
 0x126   :  { %613 = vmatmul.mubr.bf16.gmra.mrb[4].mxu1 %v364_v57 }
 0x127   :  { %1058 = vmatpush1.bf16.msra.mxu1 %v1503_v9 }
 0x128   :  { %1043 = vmatprep.subr.bf16.mxu1 %v1509_v10 }
 0x12b   :  { %1059 = vmatpush1.bf16.msra.mxu1 %v1514_v11 }
 0x12c   :  { %1044 = vmatprep.subr.bf16.mxu1 %v1521_v12 }
 0x12f   :  { %1060 = vmatpush1.bf16.msra.mxu1 %v1527_v13 }
 0x130   :  { %1045 = vmatprep.subr.bf16.mxu1 %v1533_v14 }
 0x133   :  { %1061 = vmatpush1.bf16.msra.mxu1 %v1539_v15 }
 0x134   :  { %1046 = vmatprep.subr.bf16.mxu1 %v1545_v16 }
 0x137   :  { %1062 = vmatpush1.bf16.msra.mxu1 %v1551_v17 }
 0x138   :  { %1047 = vmatprep.subr.bf16.mxu1 %v1557_v18 }
 0x13b   :  { %1063 = vmatpush1.bf16.msra.mxu1 %v1563_v19 }
 0x13c   :  { %1048 = vmatprep.subr.bf16.mxu1 %v1569_v20 }
 0x13f   :  { %1064 = vmatpush1.bf16.msra.mxu1 %v1575_v21 }
 0x140   :  { %1049 = vmatprep.subr.bf16.mxu1 %v1581_v22 }
 0x143   :  { %1065 = vmatpush1.bf16.msra.mxu1 %v1587_v23 }
 0x144   :  { %1050 = vmatprep.subr.bf16.mxu1 %v1593_v24 }
 0x147   :  { %1066 = vmatpush1.bf16.msra.mxu1 %v1599_v25 }
 0x148   :  { %1051 = vmatprep.subr.bf16.mxu1 %v1605_v26 }
 0x14b   :  { %1067 = vmatpush1.bf16.msra.mxu1 %v1611_v27 }
 0x14c   :  { %1052 = vmatprep.subr.bf16.mxu1 %v1617_v28 }
 0x14f   :  { %1068 = vmatpush1.bf16.msra.mxu1 %v1210_v29 }
 0x150   :  { %1053 = vmatprep.subr.bf16.mxu1 %v1215_v30  ;;  %v667_v30 = vld [vmem:[%s1715_s6] sm:$0x3] }
 0x151   :  { %v676_v32 = vrot.slane %v667_v30, %v1635_v36 }
 0x153   :  { %1069 = vmatpush1.bf16.msra.mxu1 %v1213_v31  ;;  %v672_v31 = vrot.slane %v667_v30, %v1630_v34 }
 0x154   :  { %1054 = vmatprep.subr.bf16.mxu1 %v1218_v59 }
 0x157   :  { %1070 = vmatpush1.bf16.msra.mxu1 %v1216_v60 }
 0x158   :  { %1055 = vmatprep.subr.bf16.mxu1 %v1221_v61 }
 0x15b   :  { %1071 = vmatpush1.bf16.msra.mxu1 %v1219_v62 }
 0x1f1   :  { %v604_v2 = vpop.f32.mrb[0].mxu1 }
 0x1f2   :  { %v605_v3 = vadd.f32 %v604_v2, %v403_v0  ;;  %v606_v4 = vpop.f32.mrb[1].mxu1 }
 0x1f3   :  { %v607_v5 = vadd.f32 %v606_v4, %v407_v1  ;;  %v608_v6 = vpop.f32.mrb[2].mxu1 }
 0x1f4   :  { %v609_v7 = vadd.f32 %v608_v6, %v403_v0  ;;  %v610_v8 = vpop.f32.mrb[3].mxu1  ;;  %v623_v10 = vmax.f32 %v605_v3, 0.0 }
 0x1f5   :  { %v611_v9 = vadd.f32 %v610_v8, %v407_v1  ;;  %v624_v12 = vmax.f32 %v607_v5, 0.0 }
 0x1f6   :  { %v625_v11 = vmax.f32 %v609_v7, 0.0 }
 0x1f7   :  { %v626_v13 = vmax.f32 %v611_v9, 0.0 }
 0x1f8   :  { %v631_v14 = vpack.c.bf16 %v625_v11, %v623_v10 }
 0x1f9   :  { %v632_v15 = vpack.c.bf16 %v626_v13, %v624_v12  ;;  %v614_v16 = vpop.f32.mrb[4].mxu1 }
 0x1fa   :  { %v615_v17 = vadd.f32 %v614_v16, %v403_v0  ;;  %v616_v18 = vpop.f32.mrb[5].mxu1 }
 0x1fb   :  { %v617_v19 = vadd.f32 %v616_v18, %v407_v1  ;;  %v618_v20 = vpop.f32.mrb[6].mxu1  ;;  %871 = vmatprep.mubr.bf16.mxu0 %v632_v15 }
 0x1fc   :  { %v619_v21 = vadd.f32 %v618_v20, %v403_v0  ;;  %v620_v22 = vpop.f32.mrb[7].mxu1  ;;  %872 = vmatmul.mubr.bf16.vlgmr.msra.gmra.mrb[8].mxu0 %v631_v14  ;;  %v627_v24 = vmax.f32 %v615_v17, 0.0 }
 0x1fd   :  { %v621_v23 = vadd.f32 %v620_v22, %v407_v1  ;;  %v628_v26 = vmax.f32 %v617_v19, 0.0 }
 0x1fe   :  { %v629_v25 = vmax.f32 %v619_v21, 0.0 }
 0x1ff   :  { %v630_v27 = vmax.f32 %v621_v23, 0.0 }
 0x200   :  { %v633_v28 = vpack.c.bf16 %v629_v25, %v627_v24 }
 0x201   :  { %v634_v29 = vpack.c.bf16 %v630_v27, %v628_v26 }
 0x203   :  { %881 = vmatprep.mubr.bf16.mxu1 %v634_v29 }
 0x204   :  { %882 = vmatmul.mubr.bf16.vlgmr.msra.gmra.mrb[8].mxu1 %v633_v28 }
 0x2cf   :  { %v873_v33 = vpop.f32.mrb[8].mxu0 }
 0x2d0   :  { %v874_v35 = vadd.f32 %v873_v33, %v672_v31  ;;  %v875_v37 = vpop.f32.mrb[9].mxu0 }
 0x2d1   :  { %v876_v38 = vadd.f32 %v875_v37, %v676_v32  ;;  %v877_v39 = vpop.f32.mrb[10].mxu0 }
 0x2d2   :  { %v878_v40 = vadd.f32 %v877_v39, %v672_v31  ;;  %v879_v41 = vpop.f32.mrb[11].mxu0  ;;  %v892_v42 = vmul.f32 %v874_v35, %v874_v35 }
 0x2d3   :  { %v880_v43 = vadd.f32 %v879_v41, %v676_v32  ;;  %v893_v44 = vmul.f32 %v876_v38, %v876_v38 }
 0x2d4   :  { %v894_v45 = vmul.f32 %v878_v40, %v878_v40 }
 0x2d5   :  { %v895_v46 = vmul.f32 %v880_v43, %v880_v43  ;;  %v900_v47 = vadd.f32 %v893_v44, %v892_v42 }
 0x2d7   :  { %901 = vadd.xlane.f32.xlu0 %v900_v47  ;;  %v883_v48 = vpop.f32.mrb[8].mxu1  ;;  %v903_v36 = vadd.f32 %v895_v46, %v894_v45 }
 0x2d8   :  { %v884_v49 = vadd.f32 %v883_v48, %v672_v31  ;;  %v885_v50 = vpop.f32.mrb[9].mxu1 }
 0x2d9   :  { %v886_v34 = vadd.f32 %v885_v50, %v676_v32  ;;  %v887_v51 = vpop.f32.mrb[10].mxu1 }
 0x2da   :  { %v888_v52 = vadd.f32 %v887_v51, %v672_v31  ;;  %v889_v53 = vpop.f32.mrb[11].mxu1  ;;  %v896_v54 = vmul.f32 %v884_v49, %v884_v49 }
 0x2db   :  { %v890_v55 = vadd.f32 %v889_v53, %v676_v32  ;;  %904 = vadd.xlane.f32.xlu0 %v903_v36  ;;  %v897_v56 = vmul.f32 %v886_v34, %v886_v34 }
 0x2dc   :  { %v898_v57 = vmul.f32 %v888_v52, %v888_v52 }
 0x2dd   :  { %v899_v58 = vmul.f32 %v890_v55, %v890_v55  ;;  %v906_v59 = vadd.f32 %v897_v56, %v896_v54 }
 0x2df   :  { %907 = vadd.xlane.f32.xlu1 %v906_v59  ;;  %v909_v60 = vadd.f32 %v899_v58, %v898_v57 }
 0x2e3   :  { %910 = vadd.xlane.f32.xlu1 %v909_v60 }
 0x364   :  { %v902_v61 = vpop.xlane.xlu0 %901 }
 0x365   :  { %v912_v62 = vmax.f32 %v902_v61, 1e-24 }
 0x367   :  { %1222 = vrsqrt.f32 %v912_v62 }
 0x368   :  { %v905_v63 = vpop.xlane.xlu0 %904 }
 0x369   :  { %v913_v0 = vmax.f32 %v905_v63, 1e-24 }
 0x36b   :  { %1224 = vrsqrt.f32 %v913_v0 }
 0x36c   :  { %v908_v1 = vpop.xlane.xlu1 %907 }
 0x36d   :  { %v914_v2 = vmax.f32 %v908_v1, 1e-24 }
 0x36f   :  { %1226 = vrsqrt.f32 %v914_v2 }
 0x370   :  { %v911_v3 = vpop.xlane.xlu1 %910 }
 0x371   :  { %v1223_v4 = vpop.eup %1222  ;;  %v915_v5 = vmax.f32 %v911_v3, 1e-24 }
 0x372   :  { %v920_v6 = vmul.f32 %v1223_v4, %v874_v35  ;;  %v921_v7 = vmul.f32 %v1223_v4, %v876_v38 }
 0x373   :  { %1228 = vrsqrt.f32 %v915_v5 }
 0x374   :  { %928 = vst [vmem:[%s1716_s7] sm:$0xff] %v920_v6  ;;  %929 = vst [vmem:[%s1716_s7 + $0x8] sm:$0xff] %v921_v7 }
 0x375   :  { %v1225_v8 = vpop.eup %1224 }
 0x376   :  { %v922_v9 = vmul.f32 %v1225_v8, %v878_v40  ;;  %v923_v10 = vmul.f32 %v1225_v8, %v880_v43 }
 0x378   :  { %930 = vst [vmem:[%s1716_s7 + $0x10] sm:$0xff] %v922_v9  ;;  %931 = vst [vmem:[%s1716_s7 + $0x18] sm:$0xff] %v923_v10 }
 0x379   :  { %v1227_v11 = vpop.eup %1226 }
 0x37a   :  { %v924_v12 = vmul.f32 %v1227_v11, %v884_v49  ;;  %v925_v13 = vmul.f32 %v1227_v11, %v886_v34 }
 0x37c   :  { %932 = vst [vmem:[%s1716_s7 + $0x20] sm:$0xff] %v924_v12  ;;  %933 = vst [vmem:[%s1716_s7 + $0x28] sm:$0xff] %v925_v13 }
 0x37d   :  { %v1229_v14 = vpop.eup %1228 }
 0x37e   :  { %v926_v15 = vmul.f32 %v1229_v14, %v888_v52  ;;  %v927_v16 = vmul.f32 %v1229_v14, %v890_v55 }
 0x380   :  { %934 = vst [vmem:[%s1716_s7 + $0x30] sm:$0xff] %v926_v15  ;;  %935 = vst [vmem:[%s1716_s7 + $0x38] sm:$0xff] %v927_v16 }

</bundles_post_ra>
